<compile_context>
chip_gen: v6e
topology: v6e:2x2x1
jax: 0.10.0
libtpu: 0.0.40
codegen_flags: <defaults>
</compile_context>

<pallas_src>
import numpy as np
import jax
import jax.numpy as jnp
from jax.experimental import pallas as pl
from jax.experimental.pallas import tpu as pltpu

# ---------------- configuration (matches MSDC defaults) ----------------
B = 2                          # batch
C = 4                          # in_channels (depthwise -> out_channels == C)
H = W = 16                     # spatial
KS = (1, 3, 5)                 # kernel_sizes
MAXP = max(k // 2 for k in KS)       # max halo = 2
HP = H + 2 * MAXP                    # padded height = 20
WP = W + 2 * MAXP                    # padded width  = 20
BC = B * C                           # lanes per spatial w position = 8
LANES = W * BC                       # output lane width = 128 (one full vreg row)
LANES_IN = WP * BC                   # padded input lane width = 160
EPS = 1e-5                           # nn.BatchNorm2d default eps


# ---------------- Pallas kernel: all three branches fused ----------------
def msdc_kernel(xf_ref, w1_ref, b1_ref, w3_ref, b3_ref, w5_ref, b5_ref,
                o1_ref, o3_ref, o5_ref):
    # xf_ref block: (HP, WP*B*C)  -- padded input, (W,B,C) flattened on lanes
    # wK_ref block: (k*k, W*B*C)  -- BN-folded depthwise weights, lane-tiled
    # bK_ref block: (1, W*B*C)    -- BN-folded bias, lane-tiled
    # oK_ref block: (H, W*B*C)    -- lane-dense output (128 lanes)

    def branch(w_ref, b_ref, k, o_ref):
        p = k // 2
        off = MAXP - p
        acc = jnp.broadcast_to(b_ref[...], (H, LANES)).astype(jnp.float32)
        t = 0
        for u in range(k):                      # static unroll over stencil taps
            for v in range(k):
                sl = xf_ref[off + u: off + u + H,
                            (off + v) * BC: (off + v) * BC + LANES]   # (H, 128)
                acc = acc + sl * w_ref[t, :]                          # lane broadcast
                t += 1
        o_ref[...] = jnp.minimum(jnp.maximum(acc, 0.0), 6.0)          # ReLU6

    branch(w1_ref, b1_ref, 1, o1_ref)
    branch(w3_ref, b3_ref, 3, o3_ref)
    branch(w5_ref, b5_ref, 5, o5_ref)


# ---------------- host-side parameter folding (BN -> conv scale/bias) ----------------
def fold_bn_branch(branch_params):
    w = branch_params["w"]           # (C, 1, k, k)  depthwise conv weight (bias=False)
    gamma = branch_params["gamma"]   # (C,)
    beta = branch_params["beta"]     # (C,)
    mean = branch_params["mean"]     # (C,) running_mean
    var = branch_params["var"]       # (C,) running_var
    k = w.shape[-1]

    scale = gamma / jnp.sqrt(var + EPS)                    # (C,)
    w_eff = w[:, 0] * scale[:, None, None]                 # (C, k, k)
    b_eff = beta - mean * scale                            # (C,)

    w_kk = jnp.transpose(w_eff.reshape(C, k * k))          # (k*k, C), row t = tap u*k+v
    w_tiled = jnp.tile(w_kk, (1, W * B))                   # (k*k, 128): lane l -> w[l % C]
    b_tiled = jnp.tile(b_eff, W * B).reshape(1, LANES)     # (1, 128)
    return w_tiled, b_tiled


# ---------------- forward (single fused pallas_call, single grid step) ----------------
def msdc_forward(x_nchw, params):
    # dw_parallel=True: every branch consumes the same input x.
    x = jnp.transpose(x_nchw, (2, 3, 0, 1))                              # (H, W, B, C)
    xp = jnp.pad(x, ((MAXP, MAXP), (MAXP, MAXP), (0, 0), (0, 0)))        # (HP, WP, B, C)
    xf = xp.reshape(HP, LANES_IN)                                        # (HP, WP*B*C)

    w1, b1 = fold_bn_branch(params[1])
    w3, b3 = fold_bn_branch(params[3])
    w5, b5 = fold_bn_branch(params[5])

    outs = pl.pallas_call(
        msdc_kernel,
        out_shape=tuple(jax.ShapeDtypeStruct((H, LANES), jnp.float32) for _ in KS),
        grid=(1,),
        in_specs=[
            pl.BlockSpec((HP, LANES_IN), lambda i: (0, 0)),   # padded input slab
            pl.BlockSpec((1, LANES), lambda i: (0, 0)),       # k=1 weights
            pl.BlockSpec((1, LANES), lambda i: (0, 0)),       # k=1 bias
            pl.BlockSpec((9, LANES), lambda i: (0, 0)),       # k=3 weights
            pl.BlockSpec((1, LANES), lambda i: (0, 0)),       # k=3 bias
            pl.BlockSpec((25, LANES), lambda i: (0, 0)),      # k=5 weights
            pl.BlockSpec((1, LANES), lambda i: (0, 0)),       # k=5 bias
        ],
        out_specs=tuple(pl.BlockSpec((H, LANES), lambda i: (0, 0)) for _ in KS),
    )(xf, w1, b1, w3, b3, w5, b5)

    # back to the module's NCHW output layout, one tensor per kernel size
    return [jnp.transpose(o.reshape(H, W, B, C), (2, 3, 0, 1)) for o in outs]


msdc_forward_jit = jax.jit(msdc_forward)


# ---------------- parameter init ----------------
def init_params(key):
    params = {}
    for k in KS:
        key, kw, kg, kb, km, kv = jax.random.split(key, 6)
        params[k] = {
            "w": 0.3 * jax.random.normal(kw, (C, 1, k, k), jnp.float32),
            "gamma": 1.0 + 0.1 * jax.random.normal(kg, (C,), jnp.float32),
            "beta": 0.1 * jax.random.normal(kb, (C,), jnp.float32),
            "mean": 0.1 * jax.random.normal(km, (C,), jnp.float32),
            "var": jax.random.uniform(kv, (C,), jnp.float32, 0.5, 1.5),
        }
    return params


# ---------------- numpy float64 reference (un-folded BN, NCHW) ----------------
def ref_msdc(x_nchw, params):
    x64 = np.asarray(x_nchw, np.float64)
    outs = []
    for k in KS:
        w = np.asarray(params[k]["w"], np.float64)[:, 0]         # (C,k,k)
        g = np.asarray(params[k]["gamma"], np.float64)
        be = np.asarray(params[k]["beta"], np.float64)
        m = np.asarray(params[k]["mean"], np.float64)
        v = np.asarray(params[k]["var"], np.float64)
        p = k // 2
        xp = np.pad(x64, ((0, 0), (0, 0), (p, p), (p, p)))
        conv = np.zeros_like(x64)
        for u in range(k):
            for vv in range(k):
                conv += (w[:, u, vv][None, :, None, None]
                         * xp[:, :, u:u + H, vv:vv + W])
        scale = g / np.sqrt(v + EPS)
        y = ((conv - m[None, :, None, None]) * scale[None, :, None, None]
             + be[None, :, None, None])
        outs.append(np.clip(y, 0.0, 6.0))
    return outs


if __name__ == "__main__":
    key = jax.random.PRNGKey(0)
    kx, kp = jax.random.split(key)
    x = jax.random.normal(kx, (B, C, H, W), jnp.float32)
    params = init_params(kp)

    outs = msdc_forward_jit(x, params)
    outs = [jax.block_until_ready(o) for o in outs]

    # correctness check against float64 numpy reference
    refs = ref_msdc(x, params)
    for o, r in zip(outs, refs):
        assert o.shape == (B, C, H, W)
        np.testing.assert_allclose(np.asarray(o, np.float64), r, rtol=1e-4, atol=1e-5)

    print("KERNEL_OK")
</pallas_src>

<mosaic_0001>
module attributes {stable_mosaic.version = 11 : i64} {
  func.func @msdc_kernel(%arg0: i32, %arg1: memref<20x160xf32, #tpu.memory_space<vmem>>, %arg2: memref<1x128xf32, #tpu.memory_space<vmem>>, %arg3: memref<1x128xf32, #tpu.memory_space<vmem>>, %arg4: memref<9x128xf32, #tpu.memory_space<vmem>>, %arg5: memref<1x128xf32, #tpu.memory_space<vmem>>, %arg6: memref<25x128xf32, #tpu.memory_space<vmem>>, %arg7: memref<1x128xf32, #tpu.memory_space<vmem>>, %arg8: memref<16x128xf32, #tpu.memory_space<vmem>>, %arg9: memref<16x128xf32, #tpu.memory_space<vmem>>, %arg10: memref<16x128xf32, #tpu.memory_space<vmem>>) attributes {dimension_semantics = [#tpu.dimension_semantics<arbitrary>], iteration_bounds = array<i64: 1>, scalar_prefetch = 0 : i64, scratch_operands = 0 : i64, tpu.core_type = #tpu.core_type<tc>, window_params = [{pipeline_mode = #tpu.pipeline_mode<synchronous>, transform_indices = @transform_0, window_bounds = array<i64: 20, 160>}, {pipeline_mode = #tpu.pipeline_mode<synchronous>, transform_indices = @transform_1, window_bounds = array<i64: 1, 128>}, {pipeline_mode = #tpu.pipeline_mode<synchronous>, transform_indices = @transform_2, window_bounds = array<i64: 1, 128>}, {pipeline_mode = #tpu.pipeline_mode<synchronous>, transform_indices = @transform_3, window_bounds = array<i64: 9, 128>}, {pipeline_mode = #tpu.pipeline_mode<synchronous>, transform_indices = @transform_4, window_bounds = array<i64: 1, 128>}, {pipeline_mode = #tpu.pipeline_mode<synchronous>, transform_indices = @transform_5, window_bounds = array<i64: 25, 128>}, {pipeline_mode = #tpu.pipeline_mode<synchronous>, transform_indices = @transform_6, window_bounds = array<i64: 1, 128>}, {pipeline_mode = #tpu.pipeline_mode<synchronous>, transform_indices = @transform_7, window_bounds = array<i64: 16, 128>}, {pipeline_mode = #tpu.pipeline_mode<synchronous>, transform_indices = @transform_8, window_bounds = array<i64: 16, 128>}, {pipeline_mode = #tpu.pipeline_mode<synchronous>, transform_indices = @transform_9, window_bounds = array<i64: 16, 128>}]} {
    %c0 = arith.constant 0 : index
    %c0_0 = arith.constant 0 : index
    %0 = vector.load %arg3[%c0, %c0_0] : memref<1x128xf32, #tpu.memory_space<vmem>>, vector<1x128xf32>
    %1 = vector.shape_cast %0 : vector<1x128xf32> to vector<1x128xf32>
    %2 = vector.broadcast %1 : vector<1x128xf32> to vector<16x128xf32>
    %c2 = arith.constant 2 : index
    %c16 = arith.constant 16 : index
    %3 = vector.load %arg1[%c2, %c16] : memref<20x160xf32, #tpu.memory_space<vmem>>, vector<16x128xf32>
    %c0_1 = arith.constant 0 : index
    %c0_2 = arith.constant 0 : index
    %4 = vector.load %arg2[%c0_1, %c0_2] : memref<1x128xf32, #tpu.memory_space<vmem>>, vector<1x128xf32>
    %5 = vector.shape_cast %4 : vector<1x128xf32> to vector<128xf32>
    %6 = vector.shape_cast %5 : vector<128xf32> to vector<1x128xf32>
    %7 = vector.broadcast %6 : vector<1x128xf32> to vector<16x128xf32>
    %8 = arith.mulf %3, %7 : vector<16x128xf32>
    %9 = arith.addf %2, %8 : vector<16x128xf32>
    %cst = arith.constant 0.000000e+00 : f32
    %10 = vector.broadcast %cst : f32 to vector<16x128xf32>
    %11 = arith.maximumf %9, %10 : vector<16x128xf32>
    %cst_3 = arith.constant 6.000000e+00 : f32
    %12 = vector.broadcast %cst_3 : f32 to vector<16x128xf32>
    %13 = arith.minimumf %11, %12 : vector<16x128xf32>
    %c0_4 = arith.constant 0 : index
    %c0_5 = arith.constant 0 : index
    %14 = vector.load %arg8[%c0_4, %c0_5] : memref<16x128xf32, #tpu.memory_space<vmem>>, vector<16x128xf32>
    tpu.vector_store %arg8[%c0_4, %c0_5], %13 {strides = array<i32>} : memref<16x128xf32, #tpu.memory_space<vmem>>, vector<16x128xf32>,
    %c0_6 = arith.constant 0 : index
    %c0_7 = arith.constant 0 : index
    %15 = vector.load %arg5[%c0_6, %c0_7] : memref<1x128xf32, #tpu.memory_space<vmem>>, vector<1x128xf32>
    %16 = vector.shape_cast %15 : vector<1x128xf32> to vector<1x128xf32>
    %17 = vector.broadcast %16 : vector<1x128xf32> to vector<16x128xf32>
    %c1 = arith.constant 1 : index
    %c8 = arith.constant 8 : index
    %18 = vector.load %arg1[%c1, %c8] : memref<20x160xf32, #tpu.memory_space<vmem>>, vector<16x128xf32>
    %c0_8 = arith.constant 0 : index
    %c0_9 = arith.constant 0 : index
    %19 = vector.load %arg4[%c0_8, %c0_9] : memref<9x128xf32, #tpu.memory_space<vmem>>, vector<1x128xf32>
    %20 = vector.shape_cast %19 : vector<1x128xf32> to vector<128xf32>
    %21 = vector.shape_cast %20 : vector<128xf32> to vector<1x128xf32>
    %22 = vector.broadcast %21 : vector<1x128xf32> to vector<16x128xf32>
    %23 = arith.mulf %18, %22 : vector<16x128xf32>
    %24 = arith.addf %17, %23 : vector<16x128xf32>
    %c1_10 = arith.constant 1 : index
    %c16_11 = arith.constant 16 : index
    %25 = vector.load %arg1[%c1_10, %c16_11] : memref<20x160xf32, #tpu.memory_space<vmem>>, vector<16x128xf32>
    %c1_12 = arith.constant 1 : index
    %c0_13 = arith.constant 0 : index
    %26 = vector.load %arg4[%c1_12, %c0_13] : memref<9x128xf32, #tpu.memory_space<vmem>>, vector<1x128xf32>
    %27 = vector.shape_cast %26 : vector<1x128xf32> to vector<128xf32>
    %28 = vector.shape_cast %27 : vector<128xf32> to vector<1x128xf32>
    %29 = vector.broadcast %28 : vector<1x128xf32> to vector<16x128xf32>
    %30 = arith.mulf %25, %29 : vector<16x128xf32>
    %31 = arith.addf %24, %30 : vector<16x128xf32>
    %c1_14 = arith.constant 1 : index
    %c24 = arith.constant 24 : index
    %32 = vector.load %arg1[%c1_14, %c24] : memref<20x160xf32, #tpu.memory_space<vmem>>, vector<16x128xf32>
    %c2_15 = arith.constant 2 : index
    %c0_16 = arith.constant 0 : index
    %33 = vector.load %arg4[%c2_15, %c0_16] : memref<9x128xf32, #tpu.memory_space<vmem>>, vector<1x128xf32>
    %34 = vector.shape_cast %33 : vector<1x128xf32> to vector<128xf32>
    %35 = vector.shape_cast %34 : vector<128xf32> to vector<1x128xf32>
    %36 = vector.broadcast %35 : vector<1x128xf32> to vector<16x128xf32>
    %37 = arith.mulf %32, %36 : vector<16x128xf32>
    %38 = arith.addf %31, %37 : vector<16x128xf32>
    %c2_17 = arith.constant 2 : index
    %c8_18 = arith.constant 8 : index
    %39 = vector.load %arg1[%c2_17, %c8_18] : memref<20x160xf32, #tpu.memory_space<vmem>>, vector<16x128xf32>
    %c3 = arith.constant 3 : index
    %c0_19 = arith.constant 0 : index
    %40 = vector.load %arg4[%c3, %c0_19] : memref<9x128xf32, #tpu.memory_space<vmem>>, vector<1x128xf32>
    %41 = vector.shape_cast %40 : vector<1x128xf32> to vector<128xf32>
    %42 = vector.shape_cast %41 : vector<128xf32> to vector<1x128xf32>
    %43 = vector.broadcast %42 : vector<1x128xf32> to vector<16x128xf32>
    %44 = arith.mulf %39, %43 : vector<16x128xf32>
    %45 = arith.addf %38, %44 : vector<16x128xf32>
    %c2_20 = arith.constant 2 : index
    %c16_21 = arith.constant 16 : index
    %46 = vector.load %arg1[%c2_20, %c16_21] : memref<20x160xf32, #tpu.memory_space<vmem>>, vector<16x128xf32>
    %c4 = arith.constant 4 : index
    %c0_22 = arith.constant 0 : index
    %47 = vector.load %arg4[%c4, %c0_22] : memref<9x128xf32, #tpu.memory_space<vmem>>, vector<1x128xf32>
    %48 = vector.shape_cast %47 : vector<1x128xf32> to vector<128xf32>
    %49 = vector.shape_cast %48 : vector<128xf32> to vector<1x128xf32>
    %50 = vector.broadcast %49 : vector<1x128xf32> to vector<16x128xf32>
    %51 = arith.mulf %46, %50 : vector<16x128xf32>
    %52 = arith.addf %45, %51 : vector<16x128xf32>
    %c2_23 = arith.constant 2 : index
    %c24_24 = arith.constant 24 : index
    %53 = vector.load %arg1[%c2_23, %c24_24] : memref<20x160xf32, #tpu.memory_space<vmem>>, vector<16x128xf32>
    %c5 = arith.constant 5 : index
    %c0_25 = arith.constant 0 : index
    %54 = vector.load %arg4[%c5, %c0_25] : memref<9x128xf32, #tpu.memory_space<vmem>>, vector<1x128xf32>
    %55 = vector.shape_cast %54 : vector<1x128xf32> to vector<128xf32>
    %56 = vector.shape_cast %55 : vector<128xf32> to vector<1x128xf32>
    %57 = vector.broadcast %56 : vector<1x128xf32> to vector<16x128xf32>
    %58 = arith.mulf %53, %57 : vector<16x128xf32>
    %59 = arith.addf %52, %58 : vector<16x128xf32>
    %c3_26 = arith.constant 3 : index
    %c8_27 = arith.constant 8 : index
    %60 = vector.load %arg1[%c3_26, %c8_27] : memref<20x160xf32, #tpu.memory_space<vmem>>, vector<16x128xf32>
    %c6 = arith.constant 6 : index
    %c0_28 = arith.constant 0 : index
    %61 = vector.load %arg4[%c6, %c0_28] : memref<9x128xf32, #tpu.memory_space<vmem>>, vector<1x128xf32>
    %62 = vector.shape_cast %61 : vector<1x128xf32> to vector<128xf32>
    %63 = vector.shape_cast %62 : vector<128xf32> to vector<1x128xf32>
    %64 = vector.broadcast %63 : vector<1x128xf32> to vector<16x128xf32>
    %65 = arith.mulf %60, %64 : vector<16x128xf32>
    %66 = arith.addf %59, %65 : vector<16x128xf32>
    %c3_29 = arith.constant 3 : index
    %c16_30 = arith.constant 16 : index
    %67 = vector.load %arg1[%c3_29, %c16_30] : memref<20x160xf32, #tpu.memory_space<vmem>>, vector<16x128xf32>
    %c7 = arith.constant 7 : index
    %c0_31 = arith.constant 0 : index
    %68 = vector.load %arg4[%c7, %c0_31] : memref<9x128xf32, #tpu.memory_space<vmem>>, vector<1x128xf32>
    %69 = vector.shape_cast %68 : vector<1x128xf32> to vector<128xf32>
    %70 = vector.shape_cast %69 : vector<128xf32> to vector<1x128xf32>
    %71 = vector.broadcast %70 : vector<1x128xf32> to vector<16x128xf32>
    %72 = arith.mulf %67, %71 : vector<16x128xf32>
    %73 = arith.addf %66, %72 : vector<16x128xf32>
    %c3_32 = arith.constant 3 : index
    %c24_33 = arith.constant 24 : index
    %74 = vector.load %arg1[%c3_32, %c24_33] : memref<20x160xf32, #tpu.memory_space<vmem>>, vector<16x128xf32>
    %c8_34 = arith.constant 8 : index
    %c0_35 = arith.constant 0 : index
    %75 = vector.load %arg4[%c8_34, %c0_35] : memref<9x128xf32, #tpu.memory_space<vmem>>, vector<1x128xf32>
    %76 = vector.shape_cast %75 : vector<1x128xf32> to vector<128xf32>
    %77 = vector.shape_cast %76 : vector<128xf32> to vector<1x128xf32>
    %78 = vector.broadcast %77 : vector<1x128xf32> to vector<16x128xf32>
    %79 = arith.mulf %74, %78 : vector<16x128xf32>
    %80 = arith.addf %73, %79 : vector<16x128xf32>
    %cst_36 = arith.constant 0.000000e+00 : f32
    %81 = vector.broadcast %cst_36 : f32 to vector<16x128xf32>
    %82 = arith.maximumf %80, %81 : vector<16x128xf32>
    %cst_37 = arith.constant 6.000000e+00 : f32
    %83 = vector.broadcast %cst_37 : f32 to vector<16x128xf32>
    %84 = arith.minimumf %82, %83 : vector<16x128xf32>
    %c0_38 = arith.constant 0 : index
    %c0_39 = arith.constant 0 : index
    %85 = vector.load %arg9[%c0_38, %c0_39] : memref<16x128xf32, #tpu.memory_space<vmem>>, vector<16x128xf32>
    tpu.vector_store %arg9[%c0_38, %c0_39], %84 {strides = array<i32>} : memref<16x128xf32, #tpu.memory_space<vmem>>, vector<16x128xf32>,
    %c0_40 = arith.constant 0 : index
    %c0_41 = arith.constant 0 : index
    %86 = vector.load %arg7[%c0_40, %c0_41] : memref<1x128xf32, #tpu.memory_space<vmem>>, vector<1x128xf32>
    %87 = vector.shape_cast %86 : vector<1x128xf32> to vector<1x128xf32>
    %88 = vector.broadcast %87 : vector<1x128xf32> to vector<16x128xf32>
    %c0_42 = arith.constant 0 : index
    %c0_43 = arith.constant 0 : index
    %89 = vector.load %arg1[%c0_42, %c0_43] : memref<20x160xf32, #tpu.memory_space<vmem>>, vector<16x128xf32>
    %c0_44 = arith.constant 0 : index
    %c0_45 = arith.constant 0 : index
    %90 = vector.load %arg6[%c0_44, %c0_45] : memref<25x128xf32, #tpu.memory_space<vmem>>, vector<1x128xf32>
    %91 = vector.shape_cast %90 : vector<1x128xf32> to vector<128xf32>
    %92 = vector.shape_cast %91 : vector<128xf32> to vector<1x128xf32>
    %93 = vector.broadcast %92 : vector<1x128xf32> to vector<16x128xf32>
    %94 = arith.mulf %89, %93 : vector<16x128xf32>
    %95 = arith.addf %88, %94 : vector<16x128xf32>
    %c0_46 = arith.constant 0 : index
    %c8_47 = arith.constant 8 : index
    %96 = vector.load %arg1[%c0_46, %c8_47] : memref<20x160xf32, #tpu.memory_space<vmem>>, vector<16x128xf32>
    %c1_48 = arith.constant 1 : index
    %c0_49 = arith.constant 0 : index
    %97 = vector.load %arg6[%c1_48, %c0_49] : memref<25x128xf32, #tpu.memory_space<vmem>>, vector<1x128xf32>
    %98 = vector.shape_cast %97 : vector<1x128xf32> to vector<128xf32>
    %99 = vector.shape_cast %98 : vector<128xf32> to vector<1x128xf32>
    %100 = vector.broadcast %99 : vector<1x128xf32> to vector<16x128xf32>
    %101 = arith.mulf %96, %100 : vector<16x128xf32>
    %102 = arith.addf %95, %101 : vector<16x128xf32>
    %c0_50 = arith.constant 0 : index
    %c16_51 = arith.constant 16 : index
    %103 = vector.load %arg1[%c0_50, %c16_51] : memref<20x160xf32, #tpu.memory_space<vmem>>, vector<16x128xf32>
    %c2_52 = arith.constant 2 : index
    %c0_53 = arith.constant 0 : index
    %104 = vector.load %arg6[%c2_52, %c0_53] : memref<25x128xf32, #tpu.memory_space<vmem>>, vector<1x128xf32>
    %105 = vector.shape_cast %104 : vector<1x128xf32> to vector<128xf32>
    %106 = vector.shape_cast %105 : vector<128xf32> to vector<1x128xf32>
    %107 = vector.broadcast %106 : vector<1x128xf32> to vector<16x128xf32>
    %108 = arith.mulf %103, %107 : vector<16x128xf32>
    %109 = arith.addf %102, %108 : vector<16x128xf32>
    %c0_54 = arith.constant 0 : index
    %c24_55 = arith.constant 24 : index
    %110 = vector.load %arg1[%c0_54, %c24_55] : memref<20x160xf32, #tpu.memory_space<vmem>>, vector<16x128xf32>
    %c3_56 = arith.constant 3 : index
    %c0_57 = arith.constant 0 : index
    %111 = vector.load %arg6[%c3_56, %c0_57] : memref<25x128xf32, #tpu.memory_space<vmem>>, vector<1x128xf32>
    %112 = vector.shape_cast %111 : vector<1x128xf32> to vector<128xf32>
    %113 = vector.shape_cast %112 : vector<128xf32> to vector<1x128xf32>
    %114 = vector.broadcast %113 : vector<1x128xf32> to vector<16x128xf32>
    %115 = arith.mulf %110, %114 : vector<16x128xf32>
    %116 = arith.addf %109, %115 : vector<16x128xf32>
    %c0_58 = arith.constant 0 : index
    %c32 = arith.constant 32 : index
    %117 = vector.load %arg1[%c0_58, %c32] : memref<20x160xf32, #tpu.memory_space<vmem>>, vector<16x128xf32>
    %c4_59 = arith.constant 4 : index
    %c0_60 = arith.constant 0 : index
    %118 = vector.load %arg6[%c4_59, %c0_60] : memref<25x128xf32, #tpu.memory_space<vmem>>, vector<1x128xf32>
    %119 = vector.shape_cast %118 : vector<1x128xf32> to vector<128xf32>
    %120 = vector.shape_cast %119 : vector<128xf32> to vector<1x128xf32>
    %121 = vector.broadcast %120 : vector<1x128xf32> to vector<16x128xf32>
    %122 = arith.mulf %117, %121 : vector<16x128xf32>
    %123 = arith.addf %116, %122 : vector<16x128xf32>
    %c1_61 = arith.constant 1 : index
    %c0_62 = arith.constant 0 : index
    %124 = vector.load %arg1[%c1_61, %c0_62] : memref<20x160xf32, #tpu.memory_space<vmem>>, vector<16x128xf32>
    %c5_63 = arith.constant 5 : index
    %c0_64 = arith.constant 0 : index
    %125 = vector.load %arg6[%c5_63, %c0_64] : memref<25x128xf32, #tpu.memory_space<vmem>>, vector<1x128xf32>
    %126 = vector.shape_cast %125 : vector<1x128xf32> to vector<128xf32>
    %127 = vector.shape_cast %126 : vector<128xf32> to vector<1x128xf32>
    %128 = vector.broadcast %127 : vector<1x128xf32> to vector<16x128xf32>
    %129 = arith.mulf %124, %128 : vector<16x128xf32>
    %130 = arith.addf %123, %129 : vector<16x128xf32>
    %c1_65 = arith.constant 1 : index
    %c8_66 = arith.constant 8 : index
    %131 = vector.load %arg1[%c1_65, %c8_66] : memref<20x160xf32, #tpu.memory_space<vmem>>, vector<16x128xf32>
    %c6_67 = arith.constant 6 : index
    %c0_68 = arith.constant 0 : index
    %132 = vector.load %arg6[%c6_67, %c0_68] : memref<25x128xf32, #tpu.memory_space<vmem>>, vector<1x128xf32>
    %133 = vector.shape_cast %132 : vector<1x128xf32> to vector<128xf32>
    %134 = vector.shape_cast %133 : vector<128xf32> to vector<1x128xf32>
    %135 = vector.broadcast %134 : vector<1x128xf32> to vector<16x128xf32>
    %136 = arith.mulf %131, %135 : vector<16x128xf32>
    %137 = arith.addf %130, %136 : vector<16x128xf32>
    %c1_69 = arith.constant 1 : index
    %c16_70 = arith.constant 16 : index
    %138 = vector.load %arg1[%c1_69, %c16_70] : memref<20x160xf32, #tpu.memory_space<vmem>>, vector<16x128xf32>
    %c7_71 = arith.constant 7 : index
    %c0_72 = arith.constant 0 : index
    %139 = vector.load %arg6[%c7_71, %c0_72] : memref<25x128xf32, #tpu.memory_space<vmem>>, vector<1x128xf32>
    %140 = vector.shape_cast %139 : vector<1x128xf32> to vector<128xf32>
    %141 = vector.shape_cast %140 : vector<128xf32> to vector<1x128xf32>
    %142 = vector.broadcast %141 : vector<1x128xf32> to vector<16x128xf32>
    %143 = arith.mulf %138, %142 : vector<16x128xf32>
    %144 = arith.addf %137, %143 : vector<16x128xf32>
    %c1_73 = arith.constant 1 : index
    %c24_74 = arith.constant 24 : index
    %145 = vector.load %arg1[%c1_73, %c24_74] : memref<20x160xf32, #tpu.memory_space<vmem>>, vector<16x128xf32>
    %c8_75 = arith.constant 8 : index
    %c0_76 = arith.constant 0 : index
    %146 = vector.load %arg6[%c8_75, %c0_76] : memref<25x128xf32, #tpu.memory_space<vmem>>, vector<1x128xf32>
    %147 = vector.shape_cast %146 : vector<1x128xf32> to vector<128xf32>
    %148 = vector.shape_cast %147 : vector<128xf32> to vector<1x128xf32>
    %149 = vector.broadcast %148 : vector<1x128xf32> to vector<16x128xf32>
    %150 = arith.mulf %145, %149 : vector<16x128xf32>
    %151 = arith.addf %144, %150 : vector<16x128xf32>
    %c1_77 = arith.constant 1 : index
    %c32_78 = arith.constant 32 : index
    %152 = vector.load %arg1[%c1_77, %c32_78] : memref<20x160xf32, #tpu.memory_space<vmem>>, vector<16x128xf32>
    %c9 = arith.constant 9 : index
    %c0_79 = arith.constant 0 : index
    %153 = vector.load %arg6[%c9, %c0_79] : memref<25x128xf32, #tpu.memory_space<vmem>>, vector<1x128xf32>
    %154 = vector.shape_cast %153 : vector<1x128xf32> to vector<128xf32>
    %155 = vector.shape_cast %154 : vector<128xf32> to vector<1x128xf32>
    %156 = vector.broadcast %155 : vector<1x128xf32> to vector<16x128xf32>
    %157 = arith.mulf %152, %156 : vector<16x128xf32>
    %158 = arith.addf %151, %157 : vector<16x128xf32>
    %c2_80 = arith.constant 2 : index
    %c0_81 = arith.constant 0 : index
    %159 = vector.load %arg1[%c2_80, %c0_81] : memref<20x160xf32, #tpu.memory_space<vmem>>, vector<16x128xf32>
    %c10 = arith.constant 10 : index
    %c0_82 = arith.constant 0 : index
    %160 = vector.load %arg6[%c10, %c0_82] : memref<25x128xf32, #tpu.memory_space<vmem>>, vector<1x128xf32>
    %161 = vector.shape_cast %160 : vector<1x128xf32> to vector<128xf32>
    %162 = vector.shape_cast %161 : vector<128xf32> to vector<1x128xf32>
    %163 = vector.broadcast %162 : vector<1x128xf32> to vector<16x128xf32>
    %164 = arith.mulf %159, %163 : vector<16x128xf32>
    %165 = arith.addf %158, %164 : vector<16x128xf32>
    %c2_83 = arith.constant 2 : index
    %c8_84 = arith.constant 8 : index
    %166 = vector.load %arg1[%c2_83, %c8_84] : memref<20x160xf32, #tpu.memory_space<vmem>>, vector<16x128xf32>
    %c11 = arith.constant 11 : index
    %c0_85 = arith.constant 0 : index
    %167 = vector.load %arg6[%c11, %c0_85] : memref<25x128xf32, #tpu.memory_space<vmem>>, vector<1x128xf32>
    %168 = vector.shape_cast %167 : vector<1x128xf32> to vector<128xf32>
    %169 = vector.shape_cast %168 : vector<128xf32> to vector<1x128xf32>
    %170 = vector.broadcast %169 : vector<1x128xf32> to vector<16x128xf32>
    %171 = arith.mulf %166, %170 : vector<16x128xf32>
    %172 = arith.addf %165, %171 : vector<16x128xf32>
    %c2_86 = arith.constant 2 : index
    %c16_87 = arith.constant 16 : index
    %173 = vector.load %arg1[%c2_86, %c16_87] : memref<20x160xf32, #tpu.memory_space<vmem>>, vector<16x128xf32>
    %c12 = arith.constant 12 : index
    %c0_88 = arith.constant 0 : index
    %174 = vector.load %arg6[%c12, %c0_88] : memref<25x128xf32, #tpu.memory_space<vmem>>, vector<1x128xf32>
    %175 = vector.shape_cast %174 : vector<1x128xf32> to vector<128xf32>
    %176 = vector.shape_cast %175 : vector<128xf32> to vector<1x128xf32>
    %177 = vector.broadcast %176 : vector<1x128xf32> to vector<16x128xf32>
    %178 = arith.mulf %173, %177 : vector<16x128xf32>
    %179 = arith.addf %172, %178 : vector<16x128xf32>
    %c2_89 = arith.constant 2 : index
    %c24_90 = arith.constant 24 : index
    %180 = vector.load %arg1[%c2_89, %c24_90] : memref<20x160xf32, #tpu.memory_space<vmem>>, vector<16x128xf32>
    %c13 = arith.constant 13 : index
    %c0_91 = arith.constant 0 : index
    %181 = vector.load %arg6[%c13, %c0_91] : memref<25x128xf32, #tpu.memory_space<vmem>>, vector<1x128xf32>
    %182 = vector.shape_cast %181 : vector<1x128xf32> to vector<128xf32>
    %183 = vector.shape_cast %182 : vector<128xf32> to vector<1x128xf32>
    %184 = vector.broadcast %183 : vector<1x128xf32> to vector<16x128xf32>
    %185 = arith.mulf %180, %184 : vector<16x128xf32>
    %186 = arith.addf %179, %185 : vector<16x128xf32>
    %c2_92 = arith.constant 2 : index
    %c32_93 = arith.constant 32 : index
    %187 = vector.load %arg1[%c2_92, %c32_93] : memref<20x160xf32, #tpu.memory_space<vmem>>, vector<16x128xf32>
    %c14 = arith.constant 14 : index
    %c0_94 = arith.constant 0 : index
    %188 = vector.load %arg6[%c14, %c0_94] : memref<25x128xf32, #tpu.memory_space<vmem>>, vector<1x128xf32>
    %189 = vector.shape_cast %188 : vector<1x128xf32> to vector<128xf32>
    %190 = vector.shape_cast %189 : vector<128xf32> to vector<1x128xf32>
    %191 = vector.broadcast %190 : vector<1x128xf32> to vector<16x128xf32>
    %192 = arith.mulf %187, %191 : vector<16x128xf32>
    %193 = arith.addf %186, %192 : vector<16x128xf32>
    %c3_95 = arith.constant 3 : index
    %c0_96 = arith.constant 0 : index
    %194 = vector.load %arg1[%c3_95, %c0_96] : memref<20x160xf32, #tpu.memory_space<vmem>>, vector<16x128xf32>
    %c15 = arith.constant 15 : index
    %c0_97 = arith.constant 0 : index
    %195 = vector.load %arg6[%c15, %c0_97] : memref<25x128xf32, #tpu.memory_space<vmem>>, vector<1x128xf32>
    %196 = vector.shape_cast %195 : vector<1x128xf32> to vector<128xf32>
    %197 = vector.shape_cast %196 : vector<128xf32> to vector<1x128xf32>
    %198 = vector.broadcast %197 : vector<1x128xf32> to vector<16x128xf32>
    %199 = arith.mulf %194, %198 : vector<16x128xf32>
    %200 = arith.addf %193, %199 : vector<16x128xf32>
    %c3_98 = arith.constant 3 : index
    %c8_99 = arith.constant 8 : index
    %201 = vector.load %arg1[%c3_98, %c8_99] : memref<20x160xf32, #tpu.memory_space<vmem>>, vector<16x128xf32>
    %c16_100 = arith.constant 16 : index
    %c0_101 = arith.constant 0 : index
    %202 = vector.load %arg6[%c16_100, %c0_101] : memref<25x128xf32, #tpu.memory_space<vmem>>, vector<1x128xf32>
    %203 = vector.shape_cast %202 : vector<1x128xf32> to vector<128xf32>
    %204 = vector.shape_cast %203 : vector<128xf32> to vector<1x128xf32>
    %205 = vector.broadcast %204 : vector<1x128xf32> to vector<16x128xf32>
    %206 = arith.mulf %201, %205 : vector<16x128xf32>
    %207 = arith.addf %200, %206 : vector<16x128xf32>
    %c3_102 = arith.constant 3 : index
    %c16_103 = arith.constant 16 : index
    %208 = vector.load %arg1[%c3_102, %c16_103] : memref<20x160xf32, #tpu.memory_space<vmem>>, vector<16x128xf32>
    %c17 = arith.constant 17 : index
    %c0_104 = arith.constant 0 : index
    %209 = vector.load %arg6[%c17, %c0_104] : memref<25x128xf32, #tpu.memory_space<vmem>>, vector<1x128xf32>
    %210 = vector.shape_cast %209 : vector<1x128xf32> to vector<128xf32>
    %211 = vector.shape_cast %210 : vector<128xf32> to vector<1x128xf32>
    %212 = vector.broadcast %211 : vector<1x128xf32> to vector<16x128xf32>
    %213 = arith.mulf %208, %212 : vector<16x128xf32>
    %214 = arith.addf %207, %213 : vector<16x128xf32>
    %c3_105 = arith.constant 3 : index
    %c24_106 = arith.constant 24 : index
    %215 = vector.load %arg1[%c3_105, %c24_106] : memref<20x160xf32, #tpu.memory_space<vmem>>, vector<16x128xf32>
    %c18 = arith.constant 18 : index
    %c0_107 = arith.constant 0 : index
    %216 = vector.load %arg6[%c18, %c0_107] : memref<25x128xf32, #tpu.memory_space<vmem>>, vector<1x128xf32>
    %217 = vector.shape_cast %216 : vector<1x128xf32> to vector<128xf32>
    %218 = vector.shape_cast %217 : vector<128xf32> to vector<1x128xf32>
    %219 = vector.broadcast %218 : vector<1x128xf32> to vector<16x128xf32>
    %220 = arith.mulf %215, %219 : vector<16x128xf32>
    %221 = arith.addf %214, %220 : vector<16x128xf32>
    %c3_108 = arith.constant 3 : index
    %c32_109 = arith.constant 32 : index
    %222 = vector.load %arg1[%c3_108, %c32_109] : memref<20x160xf32, #tpu.memory_space<vmem>>, vector<16x128xf32>
    %c19 = arith.constant 19 : index
    %c0_110 = arith.constant 0 : index
    %223 = vector.load %arg6[%c19, %c0_110] : memref<25x128xf32, #tpu.memory_space<vmem>>, vector<1x128xf32>
    %224 = vector.shape_cast %223 : vector<1x128xf32> to vector<128xf32>
    %225 = vector.shape_cast %224 : vector<128xf32> to vector<1x128xf32>
    %226 = vector.broadcast %225 : vector<1x128xf32> to vector<16x128xf32>
    %227 = arith.mulf %222, %226 : vector<16x128xf32>
    %228 = arith.addf %221, %227 : vector<16x128xf32>
    %c4_111 = arith.constant 4 : index
    %c0_112 = arith.constant 0 : index
    %229 = vector.load %arg1[%c4_111, %c0_112] : memref<20x160xf32, #tpu.memory_space<vmem>>, vector<16x128xf32>
    %c20 = arith.constant 20 : index
    %c0_113 = arith.constant 0 : index
    %230 = vector.load %arg6[%c20, %c0_113] : memref<25x128xf32, #tpu.memory_space<vmem>>, vector<1x128xf32>
    %231 = vector.shape_cast %230 : vector<1x128xf32> to vector<128xf32>
    %232 = vector.shape_cast %231 : vector<128xf32> to vector<1x128xf32>
    %233 = vector.broadcast %232 : vector<1x128xf32> to vector<16x128xf32>
    %234 = arith.mulf %229, %233 : vector<16x128xf32>
    %235 = arith.addf %228, %234 : vector<16x128xf32>
    %c4_114 = arith.constant 4 : index
    %c8_115 = arith.constant 8 : index
    %236 = vector.load %arg1[%c4_114, %c8_115] : memref<20x160xf32, #tpu.memory_space<vmem>>, vector<16x128xf32>
    %c21 = arith.constant 21 : index
    %c0_116 = arith.constant 0 : index
    %237 = vector.load %arg6[%c21, %c0_116] : memref<25x128xf32, #tpu.memory_space<vmem>>, vector<1x128xf32>
    %238 = vector.shape_cast %237 : vector<1x128xf32> to vector<128xf32>
    %239 = vector.shape_cast %238 : vector<128xf32> to vector<1x128xf32>
    %240 = vector.broadcast %239 : vector<1x128xf32> to vector<16x128xf32>
    %241 = arith.mulf %236, %240 : vector<16x128xf32>
    %242 = arith.addf %235, %241 : vector<16x128xf32>
    %c4_117 = arith.constant 4 : index
    %c16_118 = arith.constant 16 : index
    %243 = vector.load %arg1[%c4_117, %c16_118] : memref<20x160xf32, #tpu.memory_space<vmem>>, vector<16x128xf32>
    %c22 = arith.constant 22 : index
    %c0_119 = arith.constant 0 : index
    %244 = vector.load %arg6[%c22, %c0_119] : memref<25x128xf32, #tpu.memory_space<vmem>>, vector<1x128xf32>
    %245 = vector.shape_cast %244 : vector<1x128xf32> to vector<128xf32>
    %246 = vector.shape_cast %245 : vector<128xf32> to vector<1x128xf32>
    %247 = vector.broadcast %246 : vector<1x128xf32> to vector<16x128xf32>
    %248 = arith.mulf %243, %247 : vector<16x128xf32>
    %249 = arith.addf %242, %248 : vector<16x128xf32>
    %c4_120 = arith.constant 4 : index
    %c24_121 = arith.constant 24 : index
    %250 = vector.load %arg1[%c4_120, %c24_121] : memref<20x160xf32, #tpu.memory_space<vmem>>, vector<16x128xf32>
    %c23 = arith.constant 23 : index
    %c0_122 = arith.constant 0 : index
    %251 = vector.load %arg6[%c23, %c0_122] : memref<25x128xf32, #tpu.memory_space<vmem>>, vector<1x128xf32>
    %252 = vector.shape_cast %251 : vector<1x128xf32> to vector<128xf32>
    %253 = vector.shape_cast %252 : vector<128xf32> to vector<1x128xf32>
    %254 = vector.broadcast %253 : vector<1x128xf32> to vector<16x128xf32>
    %255 = arith.mulf %250, %254 : vector<16x128xf32>
    %256 = arith.addf %249, %255 : vector<16x128xf32>
    %c4_123 = arith.constant 4 : index
    %c32_124 = arith.constant 32 : index
    %257 = vector.load %arg1[%c4_123, %c32_124] : memref<20x160xf32, #tpu.memory_space<vmem>>, vector<16x128xf32>
    %c24_125 = arith.constant 24 : index
    %c0_126 = arith.constant 0 : index
    %258 = vector.load %arg6[%c24_125, %c0_126] : memref<25x128xf32, #tpu.memory_space<vmem>>, vector<1x128xf32>
    %259 = vector.shape_cast %258 : vector<1x128xf32> to vector<128xf32>
    %260 = vector.shape_cast %259 : vector<128xf32> to vector<1x128xf32>
    %261 = vector.broadcast %260 : vector<1x128xf32> to vector<16x128xf32>
    %262 = arith.mulf %257, %261 : vector<16x128xf32>
    %263 = arith.addf %256, %262 : vector<16x128xf32>
    %cst_127 = arith.constant 0.000000e+00 : f32
    %264 = vector.broadcast %cst_127 : f32 to vector<16x128xf32>
    %265 = arith.maximumf %263, %264 : vector<16x128xf32>
    %cst_128 = arith.constant 6.000000e+00 : f32
    %266 = vector.broadcast %cst_128 : f32 to vector<16x128xf32>
    %267 = arith.minimumf %265, %266 : vector<16x128xf32>
    %c0_129 = arith.constant 0 : index
    %c0_130 = arith.constant 0 : index
    %268 = vector.load %arg10[%c0_129, %c0_130] : memref<16x128xf32, #tpu.memory_space<vmem>>, vector<16x128xf32>
    tpu.vector_store %arg10[%c0_129, %c0_130], %267 {strides = array<i32>} : memref<16x128xf32, #tpu.memory_space<vmem>>, vector<16x128xf32>,
    return
  }
  func.func @transform_0(%arg0: i32) -> (i32, i32) {
    %c0_i32 = arith.constant 0 : i32
    %c0_i32_0 = arith.constant 0 : i32
    %c0_i32_1 = arith.constant 0 : i32
    return %c0_i32, %c0_i32_0 : i32, i32
  }
  func.func @transform_1(%arg0: i32) -> (i32, i32) {
    %c0_i32 = arith.constant 0 : i32
    %c0_i32_0 = arith.constant 0 : i32
    %c0_i32_1 = arith.constant 0 : i32
    return %c0_i32, %c0_i32_0 : i32, i32
  }
  func.func @transform_2(%arg0: i32) -> (i32, i32) {
    %c0_i32 = arith.constant 0 : i32
    %c0_i32_0 = arith.constant 0 : i32
    %c0_i32_1 = arith.constant 0 : i32
    return %c0_i32, %c0_i32_0 : i32, i32
  }
  func.func @transform_3(%arg0: i32) -> (i32, i32) {
    %c0_i32 = arith.constant 0 : i32
    %c0_i32_0 = arith.constant 0 : i32
    %c0_i32_1 = arith.constant 0 : i32
    return %c0_i32, %c0_i32_0 : i32, i32
  }
  func.func @transform_4(%arg0: i32) -> (i32, i32) {
    %c0_i32 = arith.constant 0 : i32
    %c0_i32_0 = arith.constant 0 : i32
    %c0_i32_1 = arith.constant 0 : i32
    return %c0_i32, %c0_i32_0 : i32, i32
  }
  func.func @transform_5(%arg0: i32) -> (i32, i32) {
    %c0_i32 = arith.constant 0 : i32
    %c0_i32_0 = arith.constant 0 : i32
    %c0_i32_1 = arith.constant 0 : i32
    return %c0_i32, %c0_i32_0 : i32, i32
  }
  func.func @transform_6(%arg0: i32) -> (i32, i32) {
    %c0_i32 = arith.constant 0 : i32
    %c0_i32_0 = arith.constant 0 : i32
    %c0_i32_1 = arith.constant 0 : i32
    return %c0_i32, %c0_i32_0 : i32, i32
  }
  func.func @transform_7(%arg0: i32) -> (i32, i32) {
    %c0_i32 = arith.constant 0 : i32
    %c0_i32_0 = arith.constant 0 : i32
    %c0_i32_1 = arith.constant 0 : i32
    return %c0_i32, %c0_i32_0 : i32, i32
  }
  func.func @transform_8(%arg0: i32) -> (i32, i32) {
    %c0_i32 = arith.constant 0 : i32
    %c0_i32_0 = arith.constant 0 : i32
    %c0_i32_1 = arith.constant 0 : i32
    return %c0_i32, %c0_i32_0 : i32, i32
  }
  func.func @transform_9(%arg0: i32) -> (i32, i32) {
    %c0_i32 = arith.constant 0 : i32
    %c0_i32_0 = arith.constant 0 : i32
    %c0_i32_1 = arith.constant 0 : i32
    return %c0_i32, %c0_i32_0 : i32, i32
  }
}

</mosaic_0001>

<bundles_post_ra>
// kernel: tile.56
= control target key start
LH: loop header
LB: loop body
LE: loop exit
PB: predicated region body
PF: predicated region fallthrough
CT: control target
= control target key end

     0   :  { %s40_s0 = inlined_call_operand.vmem [shape: f32[4], index: 0, kind: input, shape index: {}]   ;;  %s41_s1 = inlined_call_operand.vmem [shape: f32[32,4], index: 1, kind: output, shape index: {}]  }
   0x1   :  { %v4_v0 = vld [vmem:[%s40_s0] ss:$0 sm:$0xff] }
   0x2   :  { %5 = vst [vmem:[%s41_s1] sm:$0xff] %v4_v0  ;;  %12 = vst [vmem:[%s41_s1 + $0x8] sm:$0xff] %v4_v0 }
   0x3   :  { %13 = vst [vmem:[%s41_s1 + $0x10] sm:$0xff] %v4_v0  ;;  %14 = vst [vmem:[%s41_s1 + $0x18] sm:$0xff] %v4_v0 }

// kernel: tile.57
= control target key start
LH: loop header
LB: loop body
LE: loop exit
PB: predicated region body
PF: predicated region fallthrough
CT: control target
= control target key end

     0   :  { %s261_s10 = smov 124   ;;  %s262_s11 = smov 116   ;;  %vm3_vm0 = vcmask 31744   ;;  %vm9_vm1 = vcmask 1048544   ;;  %vm15_vm2 = vcmask 1015744   ;;  %vm21_vm3 = vcmask 982944   ;;  %s401_s0 = inlined_call_operand.vmem [shape: f32[32,4], index: 0, kind: input, shape index: {}]   ;;  %s402_s1 = inlined_call_operand.vmem [shape: f32[1,128], index: 1, kind: output, shape index: {}]  }
   0x1   :  { %v199_v0 = vld [vmem:[%s401_s0 + $0x1f] sm:$0x1]   ;;  %v201_v1 = vld [vmem:[%s401_s0 + $0x1d] sm:$0x1]   ;;  %v200_v2 = vld [vmem:[%s401_s0 + $0x1e] sm:$0x1]  }
   0x2   :  { %7 = vrot.lane.b32.xlu0 %v199_v0, %s261_s10  ;;  %19 = vrot.lane.b32.xlu1 %v201_v1, %s262_s11  ;;  %v202_v3 = vld [vmem:[%s401_s0 + $0x1c] sm:$0x1]   ;;  %s263_s16 = smov 120   ;;  %s264_s17 = smov 112   ;;  %v203_v4 = vld [vmem:[%s401_s0 + $0x1b] sm:$0x1]  }
   0x3   :  { %v204_v5 = vld [vmem:[%s401_s0 + $0x1a] sm:$0x1]   ;;  %s265_s22 = smov 108   ;;  %s266_s23 = smov 104   ;;  %v205_v6 = vld [vmem:[%s401_s0 + $0x19] sm:$0x1]  }
   0x4   :  { %v206_v7 = vld [vmem:[%s401_s0 + $0x18] sm:$0x1]   ;;  %s267_s28 = smov 100   ;;  %s268_s29 = smov 96   ;;  %v207_v8 = vld [vmem:[%s401_s0 + $0x17] sm:$0x1]  }
   0x5   :  { %v208_v9 = vld [vmem:[%s401_s0 + $0x16] sm:$0x1]   ;;  %v2_v10 = vld [vmem:[%s401_s0] sm:$0x1]   ;;  %s269_s7 = smov 92   ;;  %s270_s8 = smov 88  }
   0x6   :  { %13 = vrot.lane.b32.xlu0 %v200_v2, %s263_s16  ;;  %25 = vrot.lane.b32.xlu1 %v202_v3, %s264_s17  ;;  %4 = vst.msk [vmem:[#allocation0] sm:$0x1] %vm3_vm0, %v2_v10   ;;  %v209_v11 = vld [vmem:[%s401_s0 + $0x15] sm:$0x1]   ;;  %v210_v12 = vld [vmem:[%s401_s0 + $0x14] sm:$0x1]  }
   0x7   :  { %s271_s13 = smov 84   ;;  %s272_s14 = smov 80   ;;  %v211_v13 = vld [vmem:[%s401_s0 + $0x13] sm:$0x1]   ;;  %v212_v14 = vld [vmem:[%s401_s0 + $0x12] sm:$0x1]  }
   0x8   :  { %s273_s19 = smov 76   ;;  %s274_s20 = smov 72   ;;  %v213_v15 = vld [vmem:[%s401_s0 + $0x11] sm:$0x1]   ;;  %v214_v16 = vld [vmem:[%s401_s0 + $0x10] sm:$0x1]  }
   0x9   :  { %s275_s25 = smov 68   ;;  %s276_s26 = smov 64   ;;  %v215_v17 = vld [vmem:[%s401_s0 + $0xf] sm:$0x1]   ;;  %v216_v18 = vld [vmem:[%s401_s0 + $0xe] sm:$0x1]  }
   0xa   :  { %31 = vrot.lane.b32.xlu0 %v203_v4, %s265_s22  ;;  %37 = vrot.lane.b32.xlu1 %v204_v5, %s266_s23  ;;  %s277_s2 = smov 60   ;;  %s278_s3 = smov 56   ;;  %v217_v19 = vld [vmem:[%s401_s0 + $0xd] sm:$0x1]   ;;  %v218_v20 = vld [vmem:[%s401_s0 + $0xc] sm:$0x1]  }
   0xb   :  { %s280_s9 = smov 48   ;;  %v219_v21 = vld [vmem:[%s401_s0 + $0xb] sm:$0x1]   ;;  %v220_v22 = vld [vmem:[%s401_s0 + $0xa] sm:$0x1]   ;;  %s282_s15 = smov 40  }
   0xc   :  { %v221_v23 = vld [vmem:[%s401_s0 + $0x9] sm:$0x1]   ;;  %v222_v24 = vld [vmem:[%s401_s0 + $0x8] sm:$0x1]   ;;  %s284_s21 = smov 32   ;;  %s286_s27 = smov 24  }
   0xd   :  { %v223_v25 = vld [vmem:[%s401_s0 + $0x7] sm:$0x1]   ;;  %v224_v26 = vld [vmem:[%s401_s0 + $0x6] sm:$0x1]   ;;  %v225_v27 = vld [vmem:[%s401_s0 + $0x5] sm:$0x1]  }
   0xe   :  { %43 = vrot.lane.b32.xlu0 %v205_v6, %s267_s28  ;;  %49 = vrot.lane.b32.xlu1 %v206_v7, %s268_s29  ;;  %v226_v28 = vld [vmem:[%s401_s0 + $0x4] sm:$0x1]   ;;  %s288_s4 = smov 16   ;;  %v227_v29 = vld [vmem:[%s401_s0 + $0x3] sm:$0x1]   ;;  %s290_s10 = smov 8  }
   0xf   :  { %v228_v30 = vld [vmem:[%s401_s0 + $0x2] sm:$0x1]   ;;  %v229_v31 = vld [vmem:[%s401_s0 + $0x1] sm:$0x1]   ;;  %s291_s0 = smov 4   ;;  %vm27_vm4 = vcmask 950144  }
  0x10   :  { %vm33_vm5 = vcmask 917344   ;;  %vm39_vm6 = vcmask 884544   ;;  %vm45_vm7 = vcmask 851744   ;;  %vm51_vm8 = vcmask 818944  }
  0x11   :  { %vm57_vm9 = vcmask 786144   ;;  %vm63_vm10 = vcmask 753344   ;;  %vm69_vm11 = vcmask 720544   ;;  %vm75_vm12 = vcmask 687744  }
  0x12   :  { %55 = vrot.lane.b32.xlu0 %v207_v8, %s269_s7  ;;  %61 = vrot.lane.b32.xlu1 %v208_v9, %s270_s8  ;;  %s279_s8 = smov 52   ;;  %vm81_vm13 = vcmask 654944   ;;  %vm87_vm14 = vcmask 622144   ;;  %vm93_vm15 = vcmask 589344   ;;  %vm99_vm0 = vcmask 556544  }
  0x16   :  { %67 = vrot.lane.b32.xlu0 %v209_v11, %s271_s13  ;;  %73 = vrot.lane.b32.xlu1 %v210_v12, %s272_s14  ;;  %s281_s14 = smov 44  }
  0x1a   :  { %79 = vrot.lane.b32.xlu0 %v211_v13, %s273_s19  ;;  %85 = vrot.lane.b32.xlu1 %v212_v14, %s274_s20  ;;  %s283_s20 = smov 36  }
  0x1e   :  { %91 = vrot.lane.b32.xlu0 %v213_v15, %s275_s25  ;;  %97 = vrot.lane.b32.xlu1 %v214_v16, %s276_s26  ;;  %s285_s26 = smov 28  }
  0x22   :  { %103 = vrot.lane.b32.xlu0 %v215_v17, %s277_s2  ;;  %109 = vrot.lane.b32.xlu1 %v216_v18, %s278_s3  ;;  %s287_s3 = smov 20  }
  0x26   :  { %115 = vrot.lane.b32.xlu0 %v217_v19, %s279_s8  ;;  %121 = vrot.lane.b32.xlu1 %v218_v20, %s280_s9  ;;  %s289_s9 = smov 12  }
  0x2a   :  { %127 = vrot.lane.b32.xlu0 %v219_v21, %s281_s14  ;;  %133 = vrot.lane.b32.xlu1 %v220_v22, %s282_s15 }
  0x2e   :  { %139 = vrot.lane.b32.xlu0 %v221_v23, %s283_s20  ;;  %145 = vrot.lane.b32.xlu1 %v222_v24, %s284_s21 }
  0x32   :  { %151 = vrot.lane.b32.xlu0 %v223_v25, %s285_s26  ;;  %157 = vrot.lane.b32.xlu1 %v224_v26, %s286_s27 }
  0x36   :  { %163 = vrot.lane.b32.xlu0 %v225_v27, %s287_s3  ;;  %169 = vrot.lane.b32.xlu1 %v226_v28, %s288_s4 }
  0x3a   :  { %175 = vrot.lane.b32.xlu0 %v227_v29, %s289_s9  ;;  %181 = vrot.lane.b32.xlu1 %v228_v30, %s290_s10 }
  0x3e   :  { %187 = vrot.lane.b32.xlu0 %v229_v31, %s291_s0 }
  0x74   :  { %v8_v32 = vpop.permute.xlu0 %7   ;;  %v20_v33 = vpop.permute.xlu1 %19  }
  0x75   :  { %10 = vst.msk [vmem:[#allocation0] sm:$0x1] %vm9_vm1, %v8_v32   ;;  %vm105_vm1 = vcmask 523744  }
  0x78   :  { %v14_v34 = vpop.permute.xlu0 %13   ;;  %v26_v35 = vpop.permute.xlu1 %25  }
  0x79   :  { %16 = vst.msk [vmem:[#allocation0] sm:$0x1] %vm15_vm2, %v14_v34   ;;  %vm111_vm2 = vcmask 490944  }
  0x7a   :  { %22 = vst.msk [vmem:[#allocation0] sm:$0x1] %vm21_vm3, %v20_v33   ;;  %vm117_vm3 = vcmask 458144  }
  0x7b   :  { %28 = vst.msk [vmem:[#allocation0] sm:$0x1] %vm27_vm4, %v26_v35   ;;  %vm123_vm4 = vcmask 425344  }
  0x7c   :  { %v32_v36 = vpop.permute.xlu0 %31   ;;  %v38_v37 = vpop.permute.xlu1 %37  }
  0x7d   :  { %34 = vst.msk [vmem:[#allocation0] sm:$0x1] %vm33_vm5, %v32_v36   ;;  %vm129_vm5 = vcmask 392544  }
  0x7e   :  { %40 = vst.msk [vmem:[#allocation0] sm:$0x1] %vm39_vm6, %v38_v37   ;;  %vm135_vm6 = vcmask 359744  }
  0x80   :  { %v44_v38 = vpop.permute.xlu0 %43   ;;  %v50_v39 = vpop.permute.xlu1 %49  }
  0x81   :  { %46 = vst.msk [vmem:[#allocation0] sm:$0x1] %vm45_vm7, %v44_v38   ;;  %vm141_vm7 = vcmask 326944  }
  0x82   :  { %52 = vst.msk [vmem:[#allocation0] sm:$0x1] %vm51_vm8, %v50_v39   ;;  %vm147_vm8 = vcmask 294144  }
  0x84   :  { %v56_v40 = vpop.permute.xlu0 %55   ;;  %v62_v41 = vpop.permute.xlu1 %61  }
  0x85   :  { %58 = vst.msk [vmem:[#allocation0] sm:$0x1] %vm57_vm9, %v56_v40   ;;  %vm153_vm9 = vcmask 261344  }
  0x86   :  { %64 = vst.msk [vmem:[#allocation0] sm:$0x1] %vm63_vm10, %v62_v41   ;;  %vm159_vm10 = vcmask 228544  }
  0x88   :  { %v68_v42 = vpop.permute.xlu0 %67   ;;  %v74_v43 = vpop.permute.xlu1 %73  }
  0x89   :  { %70 = vst.msk [vmem:[#allocation0] sm:$0x1] %vm69_vm11, %v68_v42   ;;  %vm165_vm11 = vcmask 195744  }
  0x8a   :  { %76 = vst.msk [vmem:[#allocation0] sm:$0x1] %vm75_vm12, %v74_v43   ;;  %vm171_vm12 = vcmask 162944  }
  0x8c   :  { %v80_v44 = vpop.permute.xlu0 %79   ;;  %v86_v45 = vpop.permute.xlu1 %85  }
  0x8d   :  { %82 = vst.msk [vmem:[#allocation0] sm:$0x1] %vm81_vm13, %v80_v44   ;;  %vm177_vm13 = vcmask 130144  }
  0x8e   :  { %88 = vst.msk [vmem:[#allocation0] sm:$0x1] %vm87_vm14, %v86_v45   ;;  %vm183_vm14 = vcmask 97344  }
  0x90   :  { %v92_v46 = vpop.permute.xlu0 %91   ;;  %v98_v47 = vpop.permute.xlu1 %97  }
  0x91   :  { %94 = vst.msk [vmem:[#allocation0] sm:$0x1] %vm93_vm15, %v92_v46   ;;  %vm189_vm15 = vcmask 64544  }
  0x92   :  { %100 = vst.msk [vmem:[#allocation0] sm:$0x1] %vm99_vm0, %v98_v47  }
  0x94   :  { %v104_v48 = vpop.permute.xlu0 %103   ;;  %v110_v49 = vpop.permute.xlu1 %109  }
  0x95   :  { %106 = vst.msk [vmem:[#allocation0] sm:$0x1] %vm105_vm1, %v104_v48  }
  0x96   :  { %112 = vst.msk [vmem:[#allocation0] sm:$0x1] %vm111_vm2, %v110_v49  }
  0x98   :  { %v116_v50 = vpop.permute.xlu0 %115   ;;  %v122_v51 = vpop.permute.xlu1 %121  }
  0x99   :  { %118 = vst.msk [vmem:[#allocation0] sm:$0x1] %vm117_vm3, %v116_v50  }
  0x9a   :  { %124 = vst.msk [vmem:[#allocation0] sm:$0x1] %vm123_vm4, %v122_v51  }
  0x9c   :  { %v128_v52 = vpop.permute.xlu0 %127   ;;  %v134_v53 = vpop.permute.xlu1 %133  }
  0x9d   :  { %130 = vst.msk [vmem:[#allocation0] sm:$0x1] %vm129_vm5, %v128_v52  }
  0x9e   :  { %136 = vst.msk [vmem:[#allocation0] sm:$0x1] %vm135_vm6, %v134_v53  }
  0xa0   :  { %v140_v54 = vpop.permute.xlu0 %139   ;;  %v146_v55 = vpop.permute.xlu1 %145  }
  0xa1   :  { %142 = vst.msk [vmem:[#allocation0] sm:$0x1] %vm141_vm7, %v140_v54  }
  0xa2   :  { %148 = vst.msk [vmem:[#allocation0] sm:$0x1] %vm147_vm8, %v146_v55  }
  0xa4   :  { %v152_v56 = vpop.permute.xlu0 %151   ;;  %v158_v57 = vpop.permute.xlu1 %157  }
  0xa5   :  { %154 = vst.msk [vmem:[#allocation0] sm:$0x1] %vm153_vm9, %v152_v56  }
  0xa6   :  { %160 = vst.msk [vmem:[#allocation0] sm:$0x1] %vm159_vm10, %v158_v57  }
  0xa8   :  { %v164_v58 = vpop.permute.xlu0 %163   ;;  %v170_v59 = vpop.permute.xlu1 %169  }
  0xa9   :  { %166 = vst.msk [vmem:[#allocation0] sm:$0x1] %vm165_vm11, %v164_v58  }
  0xaa   :  { %172 = vst.msk [vmem:[#allocation0] sm:$0x1] %vm171_vm12, %v170_v59  }
  0xac   :  { %v176_v60 = vpop.permute.xlu0 %175   ;;  %v182_v61 = vpop.permute.xlu1 %181  }
  0xad   :  { %178 = vst.msk [vmem:[#allocation0] sm:$0x1] %vm177_vm13, %v176_v60  }
  0xae   :  { %184 = vst.msk [vmem:[#allocation0] sm:$0x1] %vm183_vm14, %v182_v61  }
  0xb0   :  { %v188_v62 = vpop.permute.xlu0 %187  }
  0xb1   :  { %190 = vst.msk [vmem:[#allocation0] sm:$0x1] %vm189_vm15, %v188_v62  }
  0xb8   :  { %v195_v63 = vld [vmem:[#allocation0] sm:$0x1] }
  0xb9   :  { %198 = vst [vmem:[%s402_s1] sm:$0x1] %v195_v63 }

// kernel: msdc_forward.1
= control target key start
LH: loop header
LB: loop body
LE: loop exit
PB: predicated region body
PF: predicated region fallthrough
CT: control target
= control target key end

     0   :  { %s1559_s13 = smov 16   ;;  %s1560_s14 = smov 8   ;;  %vm63_vm0 = vcmask 1045504   ;;  %vm129_vm1 = vcmask 1046528   ;;  %vm410_vm2 = vcmask 1044480   ;;  %vm82_vm3 = vcmask 916480   ;;  %s2513_s1 = inlined_call_operand.vmem [shape: f32[1,128], index: 1, kind: input, shape index: {}]   ;;  %s2514_s3 = inlined_call_operand.vmem [shape: f32[9,128], index: 3, kind: input, shape index: {}]   ;;  %s2515_s5 = inlined_call_operand.vmem [shape: f32[25,128], index: 5, kind: input, shape index: {}]   ;;  %s2516_s0 = inlined_call_operand.vmem [shape: f32[20,160], index: 0, kind: input, shape index: {}]   ;;  %s2517_s2 = inlined_call_operand.vmem [shape: f32[1,128], index: 2, kind: input, shape index: {}]   ;;  %s2518_s7 = inlined_call_operand.vmem [shape: f32[16,128], index: 7, kind: output, shape index: {0}]   ;;  %s2519_s4 = inlined_call_operand.vmem [shape: f32[1,128], index: 4, kind: input, shape index: {}]   ;;  %s2520_s8 = inlined_call_operand.vmem [shape: f32[16,128], index: 8, kind: output, shape index: {1}]   ;;  %s2521_s6 = inlined_call_operand.vmem [shape: f32[1,128], index: 6, kind: input, shape index: {}]   ;;  %s2522_s9 = inlined_call_operand.vmem [shape: f32[16,128], index: 9, kind: output, shape index: {2}]  }
   0x1   :  { %v1512_v0 = vld [vmem:[%s2513_s1] ss:$0 sm:$0xff]  ;;  %v1515_v2 = vld [vmem:[%s2514_s3 + $0x1] ss:$0 sm:$0xff]  ;;  %v1516_v3 = vld [vmem:[%s2514_s3 + $0x2] ss:$0 sm:$0xff] }
   0x2   :  { %v1514_v1 = vld [vmem:[%s2514_s3] ss:$0 sm:$0xff]  ;;  %48 = vrot.lane.b32.xlu0 %v1512_v0, %s1559_s13  ;;  %s1561_s1 = smov 24   ;;  %v1517_v4 = vld [vmem:[%s2514_s3 + $0x3] ss:$0 sm:$0xff]  ;;  %v1688_v22 = vld [vmem:[%s2516_s0 + $0x8] sm:$0xff] }
   0x3   :  { %114 = vrot.lane.b32.xlu1 %v1514_v1, %s1560_s14  ;;  %v1518_v5 = vld [vmem:[%s2514_s3 + $0x4] ss:$0 sm:$0xff]  ;;  %v1519_v6 = vld [vmem:[%s2514_s3 + $0x5] ss:$0 sm:$0xff]  ;;  %v1520_v7 = vld [vmem:[%s2514_s3 + $0x6] ss:$0 sm:$0xff] }
   0x4   :  { %v1521_v8 = vld [vmem:[%s2514_s3 + $0x7] ss:$0 sm:$0xff]  ;;  %v1522_v9 = vld [vmem:[%s2514_s3 + $0x8] ss:$0 sm:$0xff]  ;;  %v1525_v10 = vld [vmem:[%s2515_s5 + $0x1] ss:$0 sm:$0xff] }
   0x5   :  { %v1526_v11 = vld [vmem:[%s2515_s5 + $0x2] ss:$0 sm:$0xff]  ;;  %v1527_v12 = vld [vmem:[%s2515_s5 + $0x3] ss:$0 sm:$0xff]  ;;  %s1562_s21 = smov 120   ;;  %v1704_v28 = vld [vmem:[%s2516_s0 + $0x18] sm:$0xff] }
   0x6   :  { %161 = vrot.lane.b32.xlu0 %v1515_v2, %s1559_s13  ;;  %v1693_v23 = vld [vmem:[%s2516_s0] sm:$0xff]  ;;  %v1709_v29 = vld [vmem:[%s2516_s0 + $0x10] sm:$0xff]  ;;  %v37_v38 = vld [vmem:[%s2516_s0 + $0x8] sm:$0xfc]  ;;  %s1563_s30 = smov 112   ;;  %s1564_s3 = smov 104  }
   0x7   :  { %206 = vrot.lane.b32.xlu1 %v1516_v3, %s1561_s1  ;;  %v36_v35 = vld [vmem:[%s2516_s0] sm:$0xfc]  ;;  %v41_v39 = vld [vmem:[%s2516_s0 + $0x28] sm:$0x3]  ;;  %v40_v48 = vld [vmem:[%s2516_s0 + $0x20] sm:$0x3] }
   0x8   :  { %v102_v50 = vld [vmem:[%s2516_s0] sm:$0xfe]  ;;  %v103_v58 = vld [vmem:[%s2516_s0 + $0x8] sm:$0xfe]  ;;  %v106_v63 = vld [vmem:[%s2516_s0 + $0x20] sm:$0x1] }
   0x9   :  { %s1565_s26 = smov 32   ;;  %vm148_vm4 = vcmask 982016   ;;  %vm239_vm5 = vcmask 850944   ;;  %s1566_s18 = smov 96   ;;  %vm669_vm6 = vcmask 785408   ;;  %vm1301_vm7 = vcmask 1043456  }
   0xa   :  { %256 = vrot.lane.b32.xlu0 %v1517_v4, %s1560_s14  ;;  %v107_v4 = vld [vmem:[%s2516_s0 + $0x28] sm:$0x1] }
   0xb   :  { %301 = vrot.lane.b32.xlu1 %v1518_v5, %s1559_s13 }
   0xe   :  { %346 = vrot.lane.b32.xlu0 %v1519_v6, %s1561_s1 }
   0xf   :  { %395 = vrot.lane.b32.xlu1 %v1520_v7, %s1560_s14 }
  0x12   :  { %441 = vrot.lane.b32.xlu0 %v1521_v8, %s1559_s13 }
  0x13   :  { %486 = vrot.lane.b32.xlu1 %v1522_v9, %s1561_s1 }
  0x16   :  { %557 = vrot.lane.b32.xlu0 %v1525_v10, %s1560_s14 }
  0x17   :  { %588 = vrot.lane.b32.xlu1 %v1526_v11, %s1559_s13 }
  0x1a   :  { %619 = vrot.lane.b32.xlu0 %v1527_v12, %s1561_s1 }
  0x74   :  { %v49_v13 = vpop.permute.xlu0 %48 }
  0x75   :  { %v1669_v14 = vpop.permute.xlu1 %114  ;;  %v51_v36 = vmul.f32 %v49_v13, %v36_v35  ;;  %v53_v37 = vmul.f32 %v1709_v29, %v49_v13  ;;  %v52_v43 = vmul.f32 %v49_v13, %v37_v38  ;;  %v54_v46 = vmul.f32 %v1704_v28, %v49_v13 }
  0x76   :  { %v56_v47 = vmul.f32 %v49_v13, %v41_v39  ;;  %v55_v51 = vmul.f32 %v49_v13, %v40_v48  ;;  %v117_v52 = vmul.f32 %v1669_v14, %v102_v50  ;;  %v119_v53 = vmul.f32 %v1709_v29, %v1669_v14 }
  0x77   :  { %v64_v44 = vrot.slane %v51_v36, 2  ;;  %v65_v45 = vrot.slane %v53_v37, 2  ;;  %v67_v55 = vrot.slane %v52_v43, 2  ;;  %v68_v56 = vrot.slane %v54_v46, 2 }
  0x78   :  { %v1671_v15 = vpop.permute.xlu0 %161  ;;  %v72_v57 = vrot.slane %v56_v47, 2  ;;  %v70_v59 = vrot.slane %v55_v51, 2  ;;  %v130_v60 = vrot.slane %v117_v52, 1  ;;  %v118_v61 = vmul.f32 %v1669_v14, %v103_v58 }
  0x79   :  { %v1673_v16 = vpop.permute.xlu1 %206  ;;  %v66_v54 = vsel %vm63_vm0, %v64_v44, %v65_v45  ;;  %v120_v62 = vmul.f32 %v1704_v28, %v1669_v14  ;;  %v69_v0 = vsel %vm63_vm0, %v67_v55, %v68_v56  ;;  %v131_v2 = vrot.slane %v119_v53, 1 }
  0x7a   :  { %v73_v1 = vsel %vm63_vm0, %v68_v56, %v72_v57  ;;  %v121_v3 = vmul.f32 %v1669_v14, %v106_v63  ;;  %v71_v5 = vsel %vm63_vm0, %v65_v45, %v70_v59  ;;  %v133_v6 = vrot.slane %v118_v61, 1 }
  0x7b   :  { %v134_v7 = vrot.slane %v120_v62, 1  ;;  %v122_v8 = vmul.f32 %v1669_v14, %v107_v4  ;;  %v132_v9 = vsel %vm129_vm1, %v130_v60, %v131_v2  ;;  %v165_v11 = vmul.f32 %v1671_v15, %v103_v58 }
  0x7c   :  { %v1675_v17 = vpop.permute.xlu0 %256  ;;  %v136_v10 = vrot.slane %v121_v3, 1  ;;  %v167_v12 = vmul.f32 %v1704_v28, %v1671_v15  ;;  %v166_v14 = vmul.f32 %v1709_v29, %v1671_v15  ;;  %v168_v36 = vmul.f32 %v1671_v15, %v106_v63  ;;  %v248_v3 = vld [vmem:[%s2516_s0 + $0x20] sm:$0x3] }
  0x7d   :  { %v1677_v18 = vpop.permute.xlu1 %301  ;;  %v135_v13 = vsel %vm129_vm1, %v133_v6, %v134_v7  ;;  %v209_v39 = vmul.f32 %v1673_v16, %v102_v50  ;;  %v210_v44 = vmul.f32 %v1673_v16, %v103_v58  ;;  %v213_v48 = vmul.f32 %v1673_v16, %v106_v63  ;;  %v246_v58 = vld [vmem:[%s2516_s0] sm:$0xfc] }
  0x7e   :  { %v177_v35 = vrot.slane %v166_v14, 1  ;;  %v182_v43 = vrot.slane %v168_v36, 1  ;;  %v214_v53 = vmul.f32 %v1673_v16, %v107_v4  ;;  %v262_v57 = vmul.f32 %v1704_v28, %v1675_v17 }
  0x7f   :  { %v221_v46 = vrot.slane %v209_v39, 1  ;;  %v224_v51 = vrot.slane %v210_v44, 1  ;;  %v227_v55 = vrot.slane %v213_v48, 1  ;;  %v259_v61 = vmul.f32 %v1675_v17, %v246_v58 }
  0x80   :  { %v1679_v19 = vpop.permute.xlu0 %346  ;;  %v229_v60 = vrot.slane %v214_v53, 1  ;;  %v261_v62 = vmul.f32 %v1709_v29, %v1675_v17 }
  0x81   :  { %v1681_v20 = vpop.permute.xlu1 %395 }
  0x82   :  { %v272_v6 = vrot.slane %v261_v62, 2 }
  0x84   :  { %v1683_v21 = vpop.permute.xlu0 %441 }
  0x85   :  { %v1695_v24 = vpop.permute.xlu1 %486 }
  0x88   :  { %v558_v25 = vpop.permute.xlu0 %557 }
  0x89   :  { %v561_v26 = vmul.f32 %v558_v25, %v1688_v22  ;;  %v560_v27 = vmul.f32 %v558_v25, %v1693_v23  ;;  %v589_v30 = vpop.permute.xlu1 %588  ;;  %v563_v31 = vmul.f32 %v558_v25, %v1704_v28  ;;  %v562_v32 = vmul.f32 %v558_v25, %v1709_v29 }
  0x8a   :  { %v591_v33 = vmul.f32 %v589_v30, %v1693_v23  ;;  %v592_v34 = vmul.f32 %v589_v30, %v1688_v22  ;;  %v593_v41 = vmul.f32 %v589_v30, %v1709_v29  ;;  %v594_v42 = vmul.f32 %v589_v30, %v1704_v28 }
  0x8b   :  { %570 = vrot.lane.b32.xlu0 %v561_v26, %s1562_s21  ;;  %568 = vrot.lane.b32.xlu1 %v560_v27, %s1562_s21  ;;  %v138_v25 = vrot.slane %v122_v8, 1  ;;  %v164_v26 = vmul.f32 %v1671_v15, %v102_v50  ;;  %v137_v27 = vsel %vm129_vm1, %v131_v2, %v136_v10  ;;  %v179_v30 = vrot.slane %v165_v11, 1 }
  0x8c   :  { %v1729_v40 = vpop.permute.xlu0 %619  ;;  %v183_v50 = vsel %vm129_vm1, %v177_v35, %v182_v43  ;;  %v304_v10 = vmul.f32 %v1677_v18, %v246_v58  ;;  %v306_v11 = vmul.f32 %v1709_v29, %v1677_v18 }
  0x8d   :  { %v622_v49 = vmul.f32 %v1729_v40, %v1693_v23 }
  0x8e   :  { %v316_v14 = vrot.slane %v304_v10, 2 }
  0x8f   :  { %574 = vrot.lane.b32.xlu0 %v563_v31, %s1562_s21  ;;  %572 = vrot.lane.b32.xlu1 %v562_v32, %s1562_s21  ;;  %v180_v31 = vrot.slane %v167_v12, 1  ;;  %v169_v32 = vmul.f32 %v1671_v15, %v107_v4  ;;  %v212_v15 = vmul.f32 %v1704_v28, %v1673_v16 }
  0x91   :  { %v181_v37 = vsel %vm129_vm1, %v179_v30, %v180_v31  ;;  %v184_v38 = vrot.slane %v169_v32, 1  ;;  %v225_v52 = vrot.slane %v212_v15, 1  ;;  %v308_v30 = vmul.f32 %v1677_v18, %v248_v3 }
  0x93   :  { %599 = vrot.lane.b32.xlu0 %v591_v33, %s1563_s30  ;;  %601 = vrot.lane.b32.xlu1 %v592_v34, %s1563_s30  ;;  %v139_v33 = vsel %vm129_vm1, %v134_v7, %v138_v25  ;;  %v176_v34 = vrot.slane %v164_v26, 1  ;;  %v185_v45 = vsel %vm129_vm1, %v180_v31, %v184_v38  ;;  %v226_v59 = vsel %vm129_vm1, %v224_v51, %v225_v52 }
  0x94   :  { %v230_v4 = vsel %vm129_vm1, %v225_v52, %v229_v60  ;;  %v263_v7 = vmul.f32 %v1675_v17, %v248_v3  ;;  %v322_v36 = vrot.slane %v308_v30, 2  ;;  %v352_v38 = vmul.f32 %v1704_v28, %v1679_v19 }
  0x96   :  { %v365_v15 = vrot.slane %v352_v38, 2 }
  0x97   :  { %603 = vrot.lane.b32.xlu0 %v593_v41, %s1563_s30  ;;  %605 = vrot.lane.b32.xlu1 %v594_v42, %s1563_s30  ;;  %v211_v41 = vmul.f32 %v1709_v29, %v1673_v16  ;;  %v178_v42 = vsel %vm129_vm1, %v176_v34, %v177_v35  ;;  %v249_v16 = vld [vmem:[%s2516_s0 + $0x28] sm:$0x3] }
  0x98   :  { %v264_v2 = vmul.f32 %v1675_v17, %v249_v16  ;;  %v309_v34 = vmul.f32 %v1677_v18, %v249_v16 }
  0x99   :  { %v222_v47 = vrot.slane %v211_v41, 1 }
  0x9a   :  { %v324_v41 = vrot.slane %v309_v34, 2 }
  0x9b   :  { %630 = vrot.lane.b32.xlu1 %v622_v49, %s1564_s3  ;;  %74 = vrot.lane.b32.xlu0 %v66_v54, %s1563_s30  ;;  %v247_v49 = vld [vmem:[%s2516_s0 + $0x8] sm:$0xfc]  ;;  %v223_v54 = vsel %vm129_vm1, %v221_v46, %v222_v47  ;;  %v228_v63 = vsel %vm129_vm1, %v222_v47, %v227_v55 }
  0x9c   :  { %v260_v56 = vmul.f32 %v1675_v17, %v247_v49  ;;  %v305_v25 = vmul.f32 %v1677_v18, %v247_v49  ;;  %v307_v17 = vmul.f32 %v1704_v28, %v1677_v18  ;;  %v351_v18 = vmul.f32 %v1709_v29, %v1679_v19 }
  0x9e   :  { %v319_v32 = vrot.slane %v305_v25, 2  ;;  %v362_v48 = vrot.slane %v351_v18, 2 }
  0x9f   :  { %76 = vrot.lane.b32.xlu1 %v69_v0, %s1563_s30  ;;  %80 = vrot.lane.b32.xlu0 %v73_v1, %s1563_s30  ;;  %v274_v0 = vrot.slane %v260_v56, 2  ;;  %v275_v1 = vrot.slane %v262_v57, 2 }
  0xa1   :  { %v276_v8 = vsel %vm63_vm0, %v274_v0, %v275_v1 }
  0xa3   :  { %78 = vrot.lane.b32.xlu1 %v71_v5, %s1563_s30  ;;  %140 = vrot.lane.b32.xlu0 %v132_v9, %s1562_s21  ;;  %v271_v5 = vrot.slane %v259_v61, 2  ;;  %v279_v9 = vrot.slane %v264_v2, 2 }
  0xa5   :  { %v273_v12 = vsel %vm63_vm0, %v271_v5, %v272_v6  ;;  %v280_v26 = vsel %vm63_vm0, %v275_v1, %v279_v9 }
  0xa7   :  { %142 = vrot.lane.b32.xlu1 %v135_v13, %s1562_s21  ;;  %144 = vrot.lane.b32.xlu0 %v137_v27, %s1562_s21  ;;  %v277_v13 = vrot.slane %v263_v7, 2  ;;  %v317_v27 = vrot.slane %v306_v11, 2  ;;  %v447_v7 = vmul.f32 %v1704_v28, %v1683_v21 }
  0xa9   :  { %v278_v31 = vsel %vm63_vm0, %v272_v6, %v277_v13  ;;  %v318_v35 = vsel %vm63_vm0, %v316_v14, %v317_v27  ;;  %v323_v43 = vsel %vm63_vm0, %v317_v27, %v322_v36  ;;  %v460_v13 = vrot.slane %v447_v7, 3 }
  0xab   :  { %146 = vrot.lane.b32.xlu1 %v139_v33, %s1562_s21  ;;  %188 = vrot.lane.b32.xlu0 %v181_v37, %s1563_s30  ;;  %v320_v33 = vrot.slane %v307_v17, 2  ;;  %v350_v37 = vmul.f32 %v1679_v19, %v247_v49  ;;  %v353_v49 = vmul.f32 %v1679_v19, %v248_v3 }
  0xad   :  { %v321_v39 = vsel %vm63_vm0, %v319_v32, %v320_v33  ;;  %v364_v44 = vrot.slane %v350_v37, 2  ;;  %v325_v46 = vsel %vm63_vm0, %v320_v33, %v324_v41  ;;  %v367_v56 = vrot.slane %v353_v49, 2 }
  0xae   :  { %v491_v33 = vmul.f32 %v1709_v29, %v1695_v24  ;;  %v623_v49 = vmul.f32 %v1729_v40, %v1688_v22 }
  0xaf   :  { %186 = vrot.lane.b32.xlu1 %v178_v42, %s1563_s30  ;;  %192 = vrot.lane.b32.xlu0 %v185_v45, %s1563_s30  ;;  %v349_v42 = vmul.f32 %v1679_v19, %v246_v58  ;;  %v354_v45 = vmul.f32 %v1679_v19, %v249_v16  ;;  %v366_v51 = vsel %vm63_vm0, %v364_v44, %v365_v15  ;;  %v386_v19 = vld [vmem:[%s2516_s0 + $0x8] sm:$0xf8]  ;;  %v387_v16 = vld [vmem:[%s2516_s0 + $0x20] sm:$0x7] }
  0xb0   :  { %v399_v57 = vmul.f32 %v1681_v20, %v386_v19  ;;  %v401_v58 = vmul.f32 %v1704_v28, %v1681_v20  ;;  %v402_v62 = vmul.f32 %v1681_v20, %v387_v16  ;;  %v368_v0 = vsel %vm63_vm0, %v362_v48, %v367_v56 }
  0xb1   :  { %v361_v47 = vrot.slane %v349_v42, 2  ;;  %v369_v52 = vrot.slane %v354_v45, 2  ;;  %v445_v6 = vmul.f32 %v1683_v21, %v386_v19  ;;  %v448_v14 = vmul.f32 %v1683_v21, %v387_v16 }
  0xb2   :  { %v414_v1 = vrot.slane %v399_v57, 3  ;;  %v415_v2 = vrot.slane %v401_v58, 3  ;;  %v417_v5 = vrot.slane %v402_v62, 3  ;;  %v502_v38 = vrot.slane %v491_v33, 3 }
  0xb3   :  { %190 = vrot.lane.b32.xlu1 %v183_v50, %s1563_s30  ;;  %231 = vrot.lane.b32.xlu0 %v223_v54, %s1564_s3  ;;  %v385_v50 = vld [vmem:[%s2516_s0] sm:$0xf8]  ;;  %v400_v54 = vmul.f32 %v1709_v29, %v1681_v20  ;;  %v363_v55 = vsel %vm63_vm0, %v361_v47, %v362_v48  ;;  %v493_v41 = vmul.f32 %v1695_v24, %v387_v16 }
  0xb4   :  { %v398_v53 = vmul.f32 %v1681_v20, %v385_v50  ;;  %v444_v10 = vmul.f32 %v1683_v21, %v385_v50  ;;  %v489_v27 = vmul.f32 %v1695_v24, %v385_v50 }
  0xb5   :  { %v412_v61 = vrot.slane %v400_v54, 3 }
  0xb6   :  { %v411_v60 = vrot.slane %v398_v53, 3  ;;  %v456_v17 = vrot.slane %v444_v10, 3  ;;  %v501_v36 = vrot.slane %v489_v27, 3 }
  0xb7   :  { %233 = vrot.lane.b32.xlu1 %v226_v59, %s1564_s3  ;;  %235 = vrot.lane.b32.xlu0 %v228_v63, %s1564_s3  ;;  %v370_v59 = vsel %vm63_vm0, %v365_v15, %v369_v52  ;;  %v388_v63 = vld [vmem:[%s2516_s0 + $0x28] sm:$0x7]  ;;  %v418_v11 = vsel %vm410_vm2, %v412_v61, %v417_v5  ;;  %v507_v15 = vrot.slane %v493_v41, 3  ;;  %v1528_v52 = vld [vmem:[%s2515_s5 + $0x4] ss:$0 sm:$0xff] }
  0xb8   :  { %v403_v3 = vmul.f32 %v1681_v20, %v388_v63  ;;  %v446_v20 = vmul.f32 %v1709_v29, %v1683_v21  ;;  %v449_v25 = vmul.f32 %v1683_v21, %v388_v63  ;;  %v490_v21 = vmul.f32 %v1695_v24, %v386_v19 }
  0xb9   :  { %v494_v45 = vmul.f32 %v1695_v24, %v388_v63  ;;  %v508_v47 = vsel %vm410_vm2, %v502_v38, %v507_v15 }
  0xba   :  { %v419_v9 = vrot.slane %v403_v3, 3  ;;  %v464_v32 = vrot.slane %v449_v25, 3  ;;  %v504_v18 = vrot.slane %v490_v21, 3 }
  0xbb   :  { %237 = vrot.lane.b32.xlu1 %v230_v4, %s1564_s3  ;;  %283 = vrot.lane.b32.xlu0 %v276_v8, %s1562_s21  ;;  %v413_v4 = vsel %vm410_vm2, %v411_v60, %v412_v61  ;;  %v416_v8 = vsel %vm410_vm2, %v414_v1, %v415_v2  ;;  %v509_v48 = vrot.slane %v494_v45, 3  ;;  %v1511_v60 = vld [vmem:[%s2517_s2] ss:$0 sm:$0xff] }
  0xbc   :  { %v420_v30 = vsel %vm410_vm2, %v415_v2, %v419_v9  ;;  %v465_v37 = vsel %vm410_vm2, %v460_v13, %v464_v32 }
  0xbf   :  { %281 = vrot.lane.b32.xlu1 %v273_v12, %s1562_s21  ;;  %287 = vrot.lane.b32.xlu0 %v280_v26, %s1562_s21  ;;  %v459_v12 = vrot.slane %v445_v6, 3  ;;  %v457_v26 = vrot.slane %v446_v20, 3 }
  0xc1   :  { %v458_v34 = vsel %vm410_vm2, %v456_v17, %v457_v26 }
  0xc3   :  { %285 = vrot.lane.b32.xlu1 %v278_v31, %s1562_s21  ;;  %326 = vrot.lane.b32.xlu0 %v318_v35, %s1563_s30  ;;  %v461_v31 = vsel %vm410_vm2, %v459_v12, %v460_v13  ;;  %v462_v35 = vrot.slane %v448_v14, 3 }
  0xc5   :  { %v463_v42 = vsel %vm410_vm2, %v457_v26, %v462_v35 }
  0xc7   :  { %328 = vrot.lane.b32.xlu1 %v321_v39, %s1563_s30  ;;  %330 = vrot.lane.b32.xlu0 %v323_v43, %s1563_s30  ;;  %v492_v39 = vmul.f32 %v1704_v28, %v1695_v24  ;;  %v503_v43 = vsel %vm410_vm2, %v501_v36, %v502_v38  ;;  %v624_v24 = vmul.f32 %v1729_v40, %v1709_v29 }
  0xc9   :  { %v505_v44 = vrot.slane %v492_v39, 3 }
  0xcb   :  { %332 = vrot.lane.b32.xlu1 %v325_v46, %s1563_s30  ;;  %373 = vrot.lane.b32.xlu0 %v366_v51, %s1564_s3  ;;  %v506_v46 = vsel %vm410_vm2, %v504_v18, %v505_v44  ;;  %v510_v50 = vsel %vm410_vm2, %v505_v44, %v509_v48  ;;  %v625_v51 = vmul.f32 %v1729_v40, %v1704_v28  ;;  %v1513_v18 = vld [vmem:[%s2519_s4] ss:$0 sm:$0xff] }
  0xcf   :  { %371 = vrot.lane.b32.xlu1 %v363_v55, %s1564_s3  ;;  %377 = vrot.lane.b32.xlu0 %v370_v59, %s1564_s3 }
  0xd3   :  { %375 = vrot.lane.b32.xlu1 %v368_v0, %s1564_s3  ;;  %421 = vrot.lane.b32.xlu0 %v413_v4, %s1562_s21 }
  0xd7   :  { %423 = vrot.lane.b32.xlu1 %v416_v8, %s1562_s21  ;;  %425 = vrot.lane.b32.xlu0 %v418_v11, %s1562_s21 }
  0xdb   :  { %427 = vrot.lane.b32.xlu1 %v420_v30, %s1562_s21  ;;  %468 = vrot.lane.b32.xlu0 %v461_v31, %s1563_s30 }
  0xdf   :  { %466 = vrot.lane.b32.xlu1 %v458_v34, %s1563_s30  ;;  %472 = vrot.lane.b32.xlu0 %v465_v37, %s1563_s30 }
  0xe3   :  { %470 = vrot.lane.b32.xlu1 %v463_v42, %s1563_s30  ;;  %511 = vrot.lane.b32.xlu0 %v503_v43, %s1564_s3 }
  0xe7   :  { %513 = vrot.lane.b32.xlu1 %v506_v46, %s1564_s3  ;;  %515 = vrot.lane.b32.xlu0 %v508_v47, %s1564_s3 }
  0xeb   :  { %517 = vrot.lane.b32.xlu1 %v510_v50, %s1564_s3  ;;  %632 = vrot.lane.b32.xlu0 %v623_v49, %s1564_s3 }
  0xef   :  { %634 = vrot.lane.b32.xlu1 %v624_v24, %s1564_s3  ;;  %636 = vrot.lane.b32.xlu0 %v625_v51, %s1564_s3 }
  0xf3   :  { %650 = vrot.lane.b32.xlu1 %v1528_v52, %s1565_s26 }
  0xfd   :  { %v1943_v53 = vpop.permute.xlu0 %570  ;;  %v1945_v54 = vpop.permute.xlu1 %568 }
 0x101   :  { %v1947_v19 = vpop.permute.xlu0 %574  ;;  %v1949_v55 = vpop.permute.xlu1 %572 }
 0x105   :  { %v1951_v40 = vpop.permute.xlu0 %599  ;;  %v1953_v56 = vpop.permute.xlu1 %601 }
 0x109   :  { %v1955_v57 = vpop.permute.xlu0 %603  ;;  %v1957_v58 = vpop.permute.xlu1 %605 }
 0x10d   :  { %v1959_v16 = vpop.permute.xlu1 %630  ;;  %v75_v59 = vpop.permute.xlu0 %74 }
 0x111   :  { %v77_v61 = vpop.permute.xlu1 %76  ;;  %v81_v62 = vpop.permute.xlu0 %80 }
 0x112   :  { %v83_v63 = vsel %vm82_vm3, %v75_v59, %v77_v61 }
 0x113   :  { %v87_v0 = vadd.f32 %v1511_v60, %v83_v63 }
 0x115   :  { %v89_v1 = vmax.f32 %v87_v0, 0.0  ;;  %v79_v2 = vpop.permute.xlu1 %78  ;;  %v141_v3 = vpop.permute.xlu0 %140 }
 0x116   :  { %v84_v4 = vsel %vm82_vm3, %v79_v2, %v81_v62 }
 0x117   :  { %v91_v5 = vmin.f32 %v89_v1, 6.0  ;;  %v88_v6 = vadd.f32 %v1511_v60, %v84_v4 }
 0x119   :  { %93 = vst [vmem:[%s2518_s7] sm:$0xff] %v91_v5  ;;  %v90_v7 = vmax.f32 %v88_v6, 0.0  ;;  %v143_v8 = vpop.permute.xlu1 %142  ;;  %v145_v9 = vpop.permute.xlu0 %144 }
 0x11a   :  { %v149_v43 = vsel %vm148_vm4, %v141_v3, %v143_v8 }
 0x11b   :  { %v92_v10 = vmin.f32 %v90_v7, 6.0  ;;  %v153_v46 = vadd.f32 %v1513_v18, %v149_v43 }
 0x11d   :  { %94 = vst [vmem:[%s2518_s7 + $0x8] sm:$0xff] %v92_v10  ;;  %v147_v20 = vpop.permute.xlu1 %146  ;;  %v189_v11 = vpop.permute.xlu0 %188 }
 0x11e   :  { %v150_v47 = vsel %vm148_vm4, %v145_v9, %v147_v20 }
 0x11f   :  { %v154_v59 = vadd.f32 %v1513_v18, %v150_v47  ;;  %v1530_v47 = vld [vmem:[%s2515_s5 + $0x6] ss:$0 sm:$0xff] }
 0x121   :  { %v187_v12 = vpop.permute.xlu1 %186  ;;  %v193_v13 = vpop.permute.xlu0 %192 }
 0x122   :  { %v194_v45 = vsel %vm82_vm3, %v187_v12, %v189_v11 }
 0x123   :  { %v198_v49 = vadd.f32 %v194_v45, %v153_v46  ;;  %v1531_v46 = vld [vmem:[%s2515_s5 + $0x7] ss:$0 sm:$0xff] }
 0x125   :  { %v191_v25 = vpop.permute.xlu1 %190  ;;  %v232_v17 = vpop.permute.xlu0 %231 }
 0x126   :  { %v195_v51 = vsel %vm82_vm3, %v191_v25, %v193_v13 }
 0x127   :  { %v199_v63 = vadd.f32 %v195_v51, %v154_v59  ;;  %v1536_v51 = vld [vmem:[%s2515_s5 + $0xc] ss:$0 sm:$0xff] }
 0x129   :  { %v234_v26 = vpop.permute.xlu1 %233  ;;  %v236_v14 = vpop.permute.xlu0 %235 }
 0x12a   :  { %v240_v48 = vsel %vm239_vm5, %v232_v17, %v234_v26 }
 0x12b   :  { %v244_v60 = vadd.f32 %v240_v48, %v198_v49  ;;  %v1532_v48 = vld [vmem:[%s2515_s5 + $0x8] ss:$0 sm:$0xff]  ;;  %v1535_v49 = vld [vmem:[%s2515_s5 + $0xb] ss:$0 sm:$0xff] }
 0x12d   :  { %v238_v27 = vpop.permute.xlu1 %237  ;;  %v284_v30 = vpop.permute.xlu0 %283 }
 0x12e   :  { %v241_v61 = vsel %vm239_vm5, %v236_v14, %v238_v27 }
 0x12f   :  { %v245_v5 = vadd.f32 %v241_v61, %v199_v63  ;;  %v1541_v61 = vld [vmem:[%s2515_s5 + $0x11] ss:$0 sm:$0xff]  ;;  %v1543_v63 = vld [vmem:[%s2515_s5 + $0x13] ss:$0 sm:$0xff] }
 0x131   :  { %v282_v31 = vpop.permute.xlu1 %281  ;;  %v288_v32 = vpop.permute.xlu0 %287 }
 0x132   :  { %v289_v52 = vsel %vm148_vm4, %v282_v31, %v284_v30 }
 0x133   :  { %v293_v0 = vadd.f32 %v289_v52, %v244_v60  ;;  %v1538_v52 = vld [vmem:[%s2515_s5 + $0xe] ss:$0 sm:$0xff]  ;;  %v1540_v60 = vld [vmem:[%s2515_s5 + $0x10] ss:$0 sm:$0xff] }
 0x135   :  { %v286_v33 = vpop.permute.xlu1 %285  ;;  %v327_v34 = vpop.permute.xlu0 %326 }
 0x136   :  { %v290_v3 = vsel %vm148_vm4, %v286_v33, %v288_v32 }
 0x137   :  { %v294_v9 = vadd.f32 %v290_v3, %v245_v5 }
 0x139   :  { %v329_v35 = vpop.permute.xlu1 %328  ;;  %v331_v36 = vpop.permute.xlu0 %330 }
 0x13a   :  { %v334_v62 = vsel %vm82_vm3, %v327_v34, %v329_v35 }
 0x13b   :  { %v338_v6 = vadd.f32 %v334_v62, %v293_v0  ;;  %v1542_v62 = vld [vmem:[%s2515_s5 + $0x12] ss:$0 sm:$0xff]  ;;  %v1545_v0 = vld [vmem:[%s2515_s5 + $0x15] ss:$0 sm:$0xff] }
 0x13d   :  { %v333_v21 = vpop.permute.xlu1 %332  ;;  %v374_v37 = vpop.permute.xlu0 %373 }
 0x13e   :  { %v335_v7 = vsel %vm82_vm3, %v331_v36, %v333_v21 }
 0x13f   :  { %v339_v13 = vadd.f32 %v335_v7, %v294_v9  ;;  %v576_v7 = vsel %vm148_vm4, %v1945_v54, %v1943_v53  ;;  %v2086_v53 = vld [vmem:[%s2516_s0 + $0x8] sm:$0xfe]  ;;  %v2091_v54 = vld [vmem:[%s2516_s0 + $0x28] sm:$0x1] }
 0x141   :  { %v372_v38 = vpop.permute.xlu1 %371  ;;  %v378_v39 = vpop.permute.xlu0 %377 }
 0x142   :  { %v379_v4 = vsel %vm239_vm5, %v372_v38, %v374_v37 }
 0x143   :  { %v383_v10 = vadd.f32 %v379_v4, %v338_v6  ;;  %v1523_v4 = vld [vmem:[%s2521_s6] ss:$0 sm:$0xff] }
 0x145   :  { %v376_v41 = vpop.permute.xlu1 %375  ;;  %v422_v42 = vpop.permute.xlu0 %421 }
 0x146   :  { %v380_v11 = vsel %vm239_vm5, %v376_v41, %v378_v39 }
 0x147   :  { %v384_v14 = vadd.f32 %v380_v11, %v339_v13 }
 0x149   :  { %v424_v44 = vpop.permute.xlu1 %423  ;;  %v426_v15 = vpop.permute.xlu0 %425 }
 0x14a   :  { %v429_v8 = vsel %vm148_vm4, %v422_v42, %v424_v44 }
 0x14b   :  { %v433_v25 = vadd.f32 %v429_v8, %v383_v10  ;;  %v607_v8 = vsel %vm82_vm3, %v1951_v40, %v1953_v56 }
 0x14d   :  { %v428_v50 = vpop.permute.xlu1 %427  ;;  %v469_v24 = vpop.permute.xlu0 %468 }
 0x14e   :  { %v430_v26 = vsel %vm148_vm4, %v426_v15, %v428_v50 }
 0x14f   :  { %v434_v33 = vadd.f32 %v430_v26, %v384_v14 }
 0x151   :  { %v467_v1 = vpop.permute.xlu1 %466  ;;  %v473_v2 = vpop.permute.xlu0 %472 }
 0x152   :  { %v474_v12 = vsel %vm82_vm3, %v467_v1, %v469_v24  ;;  %v1537_v24 = vld [vmem:[%s2515_s5 + $0xd] ss:$0 sm:$0xff]  ;;  %v1547_v1 = vld [vmem:[%s2515_s5 + $0x17] ss:$0 sm:$0xff] }
 0x153   :  { %v478_v27 = vadd.f32 %v474_v12, %v433_v25 }
 0x155   :  { %v471_v20 = vpop.permute.xlu1 %470  ;;  %v512_v17 = vpop.permute.xlu0 %511 }
 0x156   :  { %v475_v31 = vsel %vm82_vm3, %v471_v20, %v473_v2  ;;  %v1524_v2 = vld [vmem:[%s2515_s5] ss:$0 sm:$0xff] }
 0x157   :  { %v479_v35 = vadd.f32 %v475_v31, %v434_v33  ;;  %v545_v3 = vmul.f32 %v1524_v2, %v1693_v23 }
 0x159   :  { %v514_v30 = vpop.permute.xlu1 %513  ;;  %v516_v21 = vpop.permute.xlu0 %515  ;;  %v547_v6 = vadd.f32 %v1523_v4, %v545_v3 }
 0x15a   :  { %v519_v32 = vsel %vm239_vm5, %v512_v17, %v514_v30 }
 0x15b   :  { %v523_v34 = vadd.f32 %v519_v32, %v478_v27  ;;  %v580_v9 = vadd.f32 %v576_v7, %v547_v6 }
 0x15d   :  { %v525_v36 = vmax.f32 %v523_v34, 0.0  ;;  %v518_v37 = vpop.permute.xlu1 %517  ;;  %v633_v5 = vpop.permute.xlu0 %632 }
 0x15e   :  { %v520_v38 = vsel %vm239_vm5, %v516_v21, %v518_v37  ;;  %v638_v20 = vsel %vm239_vm5, %v1959_v16, %v633_v5  ;;  %v2096_v16 = vld [vmem:[%s2516_s0] sm:$0xfe]  ;;  %v546_v37 = vmul.f32 %v1524_v2, %v1709_v29 }
 0x15f   :  { %v527_v39 = vmin.f32 %v525_v36, 6.0  ;;  %v524_v41 = vadd.f32 %v520_v38, %v479_v35 }
 0x161   :  { %529 = vst [vmem:[%s2520_s8] sm:$0xff] %v527_v39  ;;  %v526_v42 = vmax.f32 %v524_v41, 0.0  ;;  %v1996_v18 = vpop.permute.xlu1 %634  ;;  %v637_v10 = vpop.permute.xlu0 %636 }
 0x163   :  { %v528_v43 = vmin.f32 %v526_v42, 6.0 }
 0x165   :  { %530 = vst [vmem:[%s2520_s8 + $0x8] sm:$0xff] %v528_v43  ;;  %v651_v44 = vpop.permute.xlu1 %650  ;;  %v2115_v43 = vld [vmem:[%s2516_s0 + $0x20] sm:$0x1] }
 0x166   :  { %v654_v15 = vmul.f32 %v651_v44, %v1688_v22  ;;  %v653_v45 = vmul.f32 %v651_v44, %v1693_v23  ;;  %v1533_v22 = vld [vmem:[%s2515_s5 + $0x9] ss:$0 sm:$0xff]  ;;  %v655_v50 = vmul.f32 %v651_v44, %v1709_v29  ;;  %v656_v59 = vmul.f32 %v651_v44, %v1704_v28  ;;  %v1546_v44 = vld [vmem:[%s2515_s5 + $0x16] ss:$0 sm:$0xff] }
 0x167   :  { %v611_v23 = vadd.f32 %v607_v8, %v580_v9 }
 0x168   :  { %663 = vrot.lane.b32.xlu1 %v654_v15, %s1566_s18  ;;  %661 = vrot.lane.b32.xlu0 %v653_v45, %s1566_s18 }
 0x169   :  { %v642_v11 = vadd.f32 %v638_v20, %v611_v23 }
 0x16c   :  { %751 = vrot.lane.b32.xlu1 %v1531_v46, %s1559_s13  ;;  %706 = vrot.lane.b32.xlu0 %v1530_v47, %s1560_s14  ;;  %v548_v47 = vadd.f32 %v1523_v4, %v546_v37 }
 0x170   :  { %841 = vrot.lane.b32.xlu1 %v1533_v22, %s1565_s26  ;;  %796 = vrot.lane.b32.xlu0 %v1532_v48, %s1561_s1  ;;  %v577_v48 = vsel %vm148_vm4, %v1949_v55, %v1947_v19  ;;  %v1548_v19 = vld [vmem:[%s2515_s5 + $0x18] ss:$0 sm:$0xff] }
 0x174   :  { %910 = vrot.lane.b32.xlu1 %v1535_v49, %s1560_s14  ;;  %665 = vrot.lane.b32.xlu0 %v655_v50, %s1566_s18 }
 0x178   :  { %1000 = vrot.lane.b32.xlu1 %v1537_v24, %s1561_s1  ;;  %955 = vrot.lane.b32.xlu0 %v1536_v51, %s1559_s13  ;;  %v608_v24 = vsel %vm82_vm3, %v1955_v57, %v1957_v58  ;;  %v581_v58 = vadd.f32 %v577_v48, %v548_v47 }
 0x17c   :  { %667 = vrot.lane.b32.xlu1 %v656_v59, %s1566_s18  ;;  %1045 = vrot.lane.b32.xlu0 %v1538_v52, %s1565_s26 }
 0x180   :  { %1114 = vrot.lane.b32.xlu0 %v1540_v60, %s1560_s14  ;;  %1159 = vrot.lane.b32.xlu1 %v1541_v61, %s1559_s13 }
 0x184   :  { %1204 = vrot.lane.b32.xlu0 %v1542_v62, %s1561_s1  ;;  %1249 = vrot.lane.b32.xlu1 %v1543_v63, %s1565_s26  ;;  %v639_v63 = vsel %vm239_vm5, %v1996_v18, %v637_v10 }
 0x188   :  { %1319 = vrot.lane.b32.xlu1 %v1545_v0, %s1560_s14 }
 0x18c   :  { %1409 = vrot.lane.b32.xlu1 %v1547_v1, %s1561_s1  ;;  %v612_v1 = vadd.f32 %v608_v24, %v581_v58 }
 0x18e   :  { %v643_v9 = vadd.f32 %v639_v63, %v612_v1  ;;  %v2222_v63 = vld [vmem:[%s2516_s0 + $0x20] sm:$0x3]  ;;  %v2228_v1 = vld [vmem:[%s2516_s0 + $0x18] sm:$0xff] }
 0x1da   :  { %v664_v12 = vpop.permute.xlu1 %663  ;;  %v662_v13 = vpop.permute.xlu0 %661 }
 0x1db   :  { %v670_v25 = vsel %vm669_vm6, %v662_v13, %v664_v12 }
 0x1dc   :  { %v2081_v17 = vadd.f32 %v670_v25, %v642_v11 }
 0x1de   :  { %v752_v40 = vpop.permute.xlu1 %751  ;;  %v707_v56 = vpop.permute.xlu0 %706 }
 0x1df   :  { %v710_v26 = vmul.f32 %v707_v56, %v2086_v53  ;;  %v712_v14 = vmul.f32 %v707_v56, %v1704_v28  ;;  %v709_v27 = vmul.f32 %v707_v56, %v2096_v16  ;;  %v711_v30 = vmul.f32 %v707_v56, %v1709_v29 }
 0x1e0   :  { %v714_v31 = vmul.f32 %v707_v56, %v2091_v54  ;;  %v755_v32 = vmul.f32 %v752_v40, %v2086_v53  ;;  %v757_v33 = vmul.f32 %v752_v40, %v1704_v28  ;;  %v759_v46 = vmul.f32 %v752_v40, %v2091_v54 }
 0x1e1   :  { %v724_v34 = vrot.slane %v710_v26, 1  ;;  %v725_v35 = vrot.slane %v712_v14, 1  ;;  %v721_v36 = vrot.slane %v709_v27, 1  ;;  %v722_v21 = vrot.slane %v711_v30, 1 }
 0x1e2   :  { %v2106_v38 = vpop.permute.xlu1 %841  ;;  %v729_v42 = vrot.slane %v714_v31, 1  ;;  %v769_v15 = vrot.slane %v755_v32, 1  ;;  %v770_v45 = vrot.slane %v757_v33, 1  ;;  %v713_v50 = vmul.f32 %v707_v56, %v2115_v43  ;;  %v797_v51 = vpop.permute.xlu0 %796 }
 0x1e3   :  { %v726_v39 = vsel %vm129_vm1, %v724_v34, %v725_v35  ;;  %v723_v41 = vsel %vm129_vm1, %v721_v36, %v722_v21  ;;  %v754_v52 = vmul.f32 %v752_v40, %v2096_v16  ;;  %v756_v59 = vmul.f32 %v752_v40, %v1709_v29 }
 0x1e4   :  { %733 = vrot.lane.b32.xlu1 %v726_v39, %s1562_s21  ;;  %731 = vrot.lane.b32.xlu0 %v723_v41, %s1562_s21  ;;  %v730_v49 = vsel %vm129_vm1, %v725_v35, %v729_v42  ;;  %v771_v55 = vsel %vm129_vm1, %v769_v15, %v770_v45  ;;  %v774_v60 = vrot.slane %v759_v46, 1  ;;  %v800_v61 = vmul.f32 %v797_v51, %v2086_v53  ;;  %v2191_v46 = vld [vmem:[%s2516_s0 + $0x28] sm:$0x3] }
 0x1e5   :  { %v802_v57 = vmul.f32 %v797_v51, %v1704_v28  ;;  %v727_v0 = vrot.slane %v713_v50, 1  ;;  %v766_v2 = vrot.slane %v754_v52, 1  ;;  %v767_v3 = vrot.slane %v756_v59, 1 }
 0x1e6   :  { %v2121_v22 = vpop.permute.xlu1 %910  ;;  %v758_v4 = vmul.f32 %v752_v40, %v2115_v43  ;;  %v775_v5 = vsel %vm129_vm1, %v770_v45, %v774_v60  ;;  %v814_v6 = vrot.slane %v800_v61, 1  ;;  %v804_v8 = vmul.f32 %v797_v51, %v2091_v54  ;;  %v666_v20 = vpop.permute.xlu0 %665  ;;  %v2214_v60 = vld [vmem:[%s2516_s0 + $0x10] sm:$0xff] }
 0x1e7   :  { %v815_v7 = vrot.slane %v802_v57, 1  ;;  %v728_v10 = vsel %vm129_vm1, %v722_v21, %v727_v0  ;;  %v799_v11 = vmul.f32 %v797_v51, %v2096_v16  ;;  %v768_v13 = vsel %vm129_vm1, %v766_v2, %v767_v3  ;;  %v2174_v21 = vld [vmem:[%s2516_s0 + $0x8] sm:$0xfc] }
 0x1e8   :  { %737 = vrot.lane.b32.xlu1 %v730_v49, %s1562_s21  ;;  %1364 = vrot.lane.b32.xlu0 %v1546_v44, %s1559_s13  ;;  %v772_v25 = vrot.slane %v758_v4, 1  ;;  %v801_v40 = vmul.f32 %v797_v51, %v1709_v29  ;;  %v819_v26 = vrot.slane %v804_v8, 1  ;;  %v845_v14 = vmul.f32 %v2106_v38, %v2086_v53 }
 0x1e9   :  { %v816_v56 = vsel %vm129_vm1, %v814_v6, %v815_v7  ;;  %v847_v27 = vmul.f32 %v2106_v38, %v1704_v28  ;;  %v811_v31 = vrot.slane %v799_v11, 1  ;;  %v803_v33 = vmul.f32 %v797_v51, %v2115_v43  ;;  %v2202_v51 = vld [vmem:[%s2516_s0] sm:$0xfc] }
 0x1ea   :  { %v2141_v62 = vpop.permute.xlu1 %1000  ;;  %v773_v30 = vsel %vm129_vm1, %v767_v3, %v772_v25  ;;  %v812_v32 = vrot.slane %v801_v40, 1  ;;  %v820_v34 = vsel %vm129_vm1, %v815_v7, %v819_v26  ;;  %v859_v35 = vrot.slane %v845_v14, 1  ;;  %v956_v59 = vpop.permute.xlu0 %955 }
 0x1eb   :  { %v860_v36 = vrot.slane %v847_v27, 1  ;;  %v849_v53 = vmul.f32 %v2106_v38, %v2091_v54  ;;  %v817_v39 = vrot.slane %v803_v33, 1  ;;  %v844_v41 = vmul.f32 %v2106_v38, %v2096_v16 }
 0x1ec   :  { %1454 = vrot.lane.b32.xlu0 %v1548_v19, %s1565_s26  ;;  %778 = vrot.lane.b32.xlu1 %v771_v55, %s1563_s30  ;;  %v813_v37 = vsel %vm129_vm1, %v811_v31, %v812_v32  ;;  %v846_v42 = vmul.f32 %v2106_v38, %v1709_v29  ;;  %v914_v15 = vmul.f32 %v2121_v22, %v2174_v21 }
 0x1ed   :  { %v861_v54 = vsel %vm129_vm1, %v859_v35, %v860_v36  ;;  %v864_v44 = vrot.slane %v849_v53, 1  ;;  %v916_v45 = vmul.f32 %v2121_v22, %v1704_v28  ;;  %v818_v47 = vsel %vm129_vm1, %v812_v32, %v817_v39 }
 0x1ee   :  { %v668_v23 = vpop.permute.xlu1 %667  ;;  %v856_v29 = vrot.slane %v844_v41, 1  ;;  %v857_v48 = vrot.slane %v846_v42, 1  ;;  %v848_v49 = vmul.f32 %v2106_v38, %v2115_v43  ;;  %v928_v24 = vrot.slane %v914_v15, 2 }
 0x1ef   :  { %v671_v18 = vsel %vm669_vm6, %v666_v20, %v668_v23  ;;  %v865_v50 = vsel %vm129_vm1, %v860_v36, %v864_v44  ;;  %v929_v28 = vrot.slane %v916_v45, 2  ;;  %v918_v52 = vmul.f32 %v2121_v22, %v2191_v46 }
 0x1f0   :  { %v2153_v12 = vadd.f32 %v671_v18, %v643_v9  ;;  %735 = vrot.lane.b32.xlu0 %v728_v10, %s1562_s21  ;;  %782 = vrot.lane.b32.xlu1 %v775_v5, %s1563_s30  ;;  %v858_v19 = vsel %vm129_vm1, %v856_v29, %v857_v48  ;;  %v862_v38 = vrot.slane %v848_v49, 1  ;;  %v913_v55 = vmul.f32 %v2121_v22, %v2202_v51 }
 0x1f1   :  { %v915_v61 = vmul.f32 %v2214_v60, %v2121_v22  ;;  %v930_v57 = vsel %vm63_vm0, %v928_v24, %v929_v28  ;;  %v933_v58 = vrot.slane %v918_v52, 2  ;;  %v959_v0 = vmul.f32 %v956_v59, %v2174_v21  ;;  %v2275_v24 = vld [vmem:[%s2516_s0 + $0x8] sm:$0xf8] }
 0x1f2   :  { %v961_v2 = vmul.f32 %v2228_v1, %v956_v59  ;;  %v863_v3 = vsel %vm129_vm1, %v857_v48, %v862_v38  ;;  %v925_v4 = vrot.slane %v913_v55, 2  ;;  %v917_v6 = vmul.f32 %v2121_v22, %v2222_v63 }
 0x1f3   :  { %v926_v5 = vrot.slane %v915_v61, 2  ;;  %v934_v7 = vsel %vm63_vm0, %v929_v28, %v933_v58  ;;  %v973_v8 = vrot.slane %v959_v0, 2  ;;  %v963_v20 = vmul.f32 %v956_v59, %v2191_v46  ;;  %v2288_v61 = vld [vmem:[%s2516_s0 + $0x28] sm:$0x7] }
 0x1f4   :  { %776 = vrot.lane.b32.xlu0 %v768_v13, %s1563_s30  ;;  %823 = vrot.lane.b32.xlu1 %v816_v56, %s1564_s3  ;;  %v974_v9 = vrot.slane %v961_v2, 2  ;;  %v931_v18 = vrot.slane %v917_v6, 2  ;;  %v958_v10 = vmul.f32 %v956_v59, %v2202_v51  ;;  %v960_v11 = vmul.f32 %v2214_v60, %v956_v59  ;;  %v2298_v6 = vld [vmem:[%s2516_s0] sm:$0xf8] }
 0x1f5   :  { %v927_v23 = vsel %vm63_vm0, %v925_v4, %v926_v5  ;;  %v978_v22 = vrot.slane %v963_v20, 2  ;;  %v1004_v25 = vmul.f32 %v2141_v62, %v2174_v21  ;;  %v1006_v40 = vmul.f32 %v2228_v1, %v2141_v62 }
 0x1f6   :  { %v975_v13 = vsel %vm63_vm0, %v973_v8, %v974_v9  ;;  %v932_v56 = vsel %vm63_vm0, %v926_v5, %v931_v18  ;;  %v970_v26 = vrot.slane %v958_v10, 2  ;;  %v971_v14 = vrot.slane %v960_v11, 2  ;;  %v1160_v8 = vpop.permute.xlu1 %1159 }
 0x1f7   :  { %v962_v27 = vmul.f32 %v956_v59, %v2222_v63  ;;  %v1018_v31 = vrot.slane %v1004_v25, 2  ;;  %v1019_v32 = vrot.slane %v1006_v40, 2  ;;  %v1008_v33 = vmul.f32 %v2141_v62, %v2191_v46 }
 0x1f8   :  { %780 = vrot.lane.b32.xlu0 %v773_v30, %s1563_s30  ;;  %827 = vrot.lane.b32.xlu1 %v820_v34, %s1564_s3  ;;  %v979_v30 = vsel %vm63_vm0, %v974_v9, %v978_v22  ;;  %v1046_v34 = vpop.permute.xlu0 %1045  ;;  %v972_v35 = vsel %vm63_vm0, %v970_v26, %v971_v14  ;;  %v1003_v53 = vmul.f32 %v2141_v62, %v2202_v51 }
 0x1f9   :  { %v976_v36 = vrot.slane %v962_v27, 2  ;;  %v1020_v39 = vsel %vm63_vm0, %v1018_v31, %v1019_v32  ;;  %v1023_v41 = vrot.slane %v1008_v33, 2  ;;  %v1049_v42 = vmul.f32 %v1046_v34, %v2174_v21 }
 0x1fa   :  { %v1015_v15 = vrot.slane %v1003_v53, 2  ;;  %v1050_v59 = vmul.f32 %v2214_v60, %v1046_v34  ;;  %v1052_v2 = vmul.f32 %v1046_v34, %v2222_v63  ;;  %v1163_v22 = vmul.f32 %v1160_v8, %v2275_v24 }
 0x1fb   :  { %v977_v44 = vsel %vm63_vm0, %v971_v14, %v976_v36  ;;  %v1024_v29 = vsel %vm63_vm0, %v1019_v32, %v1023_v41  ;;  %v1063_v48 = vrot.slane %v1049_v42, 2  ;;  %v1165_v25 = vmul.f32 %v2228_v1, %v1160_v8 }
 0x1fc   :  { %821 = vrot.lane.b32.xlu0 %v813_v37, %s1564_s3  ;;  %868 = vrot.lane.b32.xlu1 %v861_v54, %s1566_s18  ;;  %v1005_v37 = vmul.f32 %v2214_v60, %v2141_v62  ;;  %v1051_v54 = vmul.f32 %v2228_v1, %v1046_v34  ;;  %v1115_v21 = vpop.permute.xlu0 %1114  ;;  %v1061_v0 = vrot.slane %v1050_v59, 2  ;;  %v1066_v20 = vrot.slane %v1052_v2, 2 }
 0x1fd   :  { %v1118_v38 = vmul.f32 %v1115_v21, %v2275_v24  ;;  %v1120_v55 = vmul.f32 %v2228_v1, %v1115_v21  ;;  %v1119_v18 = vmul.f32 %v2214_v60, %v1115_v21  ;;  %v1178_v31 = vrot.slane %v1165_v25, 3 }
 0x1fe   :  { %v1016_v45 = vrot.slane %v1005_v37, 2  ;;  %v1064_v49 = vrot.slane %v1051_v54, 2  ;;  %v1067_v40 = vsel %vm63_vm0, %v1061_v0, %v1066_v20  ;;  %v1167_v32 = vmul.f32 %v1160_v8, %v2288_v61 }
 0x1ff   :  { %v1132_v4 = vrot.slane %v1118_v38, 3  ;;  %v1133_v5 = vrot.slane %v1120_v55, 3  ;;  %v1130_v26 = vrot.slane %v1119_v18, 3  ;;  %v1162_v36 = vmul.f32 %v1160_v8, %v2298_v6 }
 0x200   :  { %825 = vrot.lane.b32.xlu0 %v818_v47, %s1564_s3  ;;  %872 = vrot.lane.b32.xlu1 %v865_v50, %s1566_s18  ;;  %v1007_v47 = vmul.f32 %v2141_v62, %v2222_v63  ;;  %v1053_v50 = vmul.f32 %v1046_v34, %v2191_v46  ;;  %v1017_v28 = vsel %vm63_vm0, %v1015_v15, %v1016_v45  ;;  %v1205_v33 = vpop.permute.xlu0 %1204 }
 0x201   :  { %v1048_v62 = vmul.f32 %v1046_v34, %v2202_v51  ;;  %v1134_v10 = vsel %vm410_vm2, %v1132_v4, %v1133_v5  ;;  %v1164_v53 = vmul.f32 %v2214_v60, %v1160_v8  ;;  %v1208_v41 = vmul.f32 %v1205_v33, %v2275_v24 }
 0x202   :  { %v1021_v52 = vrot.slane %v1007_v47, 2  ;;  %v1068_v46 = vrot.slane %v1053_v50, 2  ;;  %v1210_v42 = vmul.f32 %v2228_v1, %v1205_v33  ;;  %v1250_v50 = vpop.permute.xlu1 %1249 }
 0x203   :  { %v1060_v58 = vrot.slane %v1048_v62, 2  ;;  %v1175_v15 = vrot.slane %v1164_v53, 3  ;;  %v1209_v62 = vmul.f32 %v2214_v60, %v1205_v33  ;;  %v1255_v38 = vmul.f32 %v2228_v1, %v1250_v50 }
 0x204   :  { %866 = vrot.lane.b32.xlu0 %v858_v19, %s1566_s18  ;;  %937 = vrot.lane.b32.xlu1 %v930_v57, %s1562_s21  ;;  %v1065_v19 = vsel %vm63_vm0, %v1063_v48, %v1064_v49  ;;  %v1022_v57 = vsel %vm63_vm0, %v1016_v45, %v1021_v52  ;;  %v1223_v48 = vrot.slane %v1210_v42, 3  ;;  %v1207_v52 = vmul.f32 %v1205_v33, %v2298_v6 }
 0x205   :  { %v1062_v9 = vsel %vm63_vm0, %v1060_v58, %v1061_v0  ;;  %v1220_v58 = vrot.slane %v1209_v62, 3  ;;  %v1268_v4 = vrot.slane %v1255_v38, 3  ;;  %v1252_v20 = vmul.f32 %v1250_v50, %v2298_v6 }
 0x208   :  { %870 = vrot.lane.b32.xlu0 %v863_v3, %s1566_s18  ;;  %941 = vrot.lane.b32.xlu1 %v934_v7, %s1562_s21  ;;  %v1069_v3 = vsel %vm63_vm0, %v1064_v49, %v1068_v46  ;;  %v1122_v7 = vmul.f32 %v1115_v21, %v2288_v61  ;;  %v1212_v49 = vmul.f32 %v1205_v33, %v2288_v61 }
 0x209   :  { %v1253_v46 = vmul.f32 %v1250_v50, %v2275_v24  ;;  %v2351_v24 = vld [vmem:[%s2516_s0 + $0x8] sm:$0xf0] }
 0x20a   :  { %v1137_v11 = vrot.slane %v1122_v7, 3  ;;  %v1320_v7 = vpop.permute.xlu1 %1319 }
 0x20b   :  { %v1324_v53 = vmul.f32 %v2214_v60, %v1320_v7 }
 0x20c   :  { %935 = vrot.lane.b32.xlu0 %v927_v23, %s1562_s21  ;;  %982 = vrot.lane.b32.xlu1 %v975_v13, %s1563_s30  ;;  %v1117_v23 = vmul.f32 %v1115_v21, %v2298_v6  ;;  %v2310_v13 = vld [vmem:[%s2516_s0 + $0x20] sm:$0x7]  ;;  %v1138_v27 = vsel %vm410_vm2, %v1133_v5, %v1137_v11  ;;  %v1257_v5 = vmul.f32 %v1250_v50, %v2288_v61 }
 0x20d   :  { %v1121_v14 = vmul.f32 %v1115_v21, %v2310_v13  ;;  %v1166_v45 = vmul.f32 %v1160_v8, %v2310_v13  ;;  %v1211_v0 = vmul.f32 %v1205_v33, %v2310_v13  ;;  %v1325_v11 = vmul.f32 %v2228_v1, %v1320_v7 }
 0x20e   :  { %v1272_v61 = vrot.slane %v1257_v5, 3 }
 0x210   :  { %939 = vrot.lane.b32.xlu0 %v932_v56, %s1562_s21  ;;  %986 = vrot.lane.b32.xlu1 %v979_v30, %s1563_s30  ;;  %v1129_v56 = vrot.slane %v1117_v23, 3  ;;  %v1177_v30 = vrot.slane %v1163_v22, 3  ;;  %v1254_v23 = vmul.f32 %v2214_v60, %v1250_v50  ;;  %v2364_v22 = vld [vmem:[%s2516_s0 + $0x28] sm:$0xf] }
 0x212   :  { %v1131_v34 = vsel %vm410_vm2, %v1129_v56, %v1130_v26  ;;  %v1179_v37 = vsel %vm410_vm2, %v1177_v30, %v1178_v31  ;;  %v1265_v56 = vrot.slane %v1254_v23, 3  ;;  %v1338_v30 = vrot.slane %v1325_v11, 4 }
 0x214   :  { %980 = vrot.lane.b32.xlu0 %v972_v35, %s1563_s30  ;;  %1027 = vrot.lane.b32.xlu1 %v1020_v39, %s1564_s3  ;;  %v1135_v35 = vrot.slane %v1121_v14, 3  ;;  %v1182_v39 = vrot.slane %v1167_v32, 3  ;;  %v1273_v14 = vsel %vm410_vm2, %v1268_v4, %v1272_v61  ;;  %v1327_v32 = vmul.f32 %v1320_v7, %v2364_v22 }
 0x216   :  { %v1136_v54 = vsel %vm410_vm2, %v1130_v26, %v1135_v35  ;;  %v1183_v47 = vsel %vm410_vm2, %v1178_v31, %v1182_v39  ;;  %v1256_v26 = vmul.f32 %v1250_v50, %v2310_v13  ;;  %v2374_v31 = vld [vmem:[%s2516_s0] sm:$0xf0]  ;;  %v2386_v39 = vld [vmem:[%s2516_s0 + $0x20] sm:$0xf] }
 0x218   :  { %984 = vrot.lane.b32.xlu0 %v977_v44, %s1563_s30  ;;  %1031 = vrot.lane.b32.xlu1 %v1024_v29, %s1564_s3  ;;  %v1174_v44 = vrot.slane %v1162_v36, 3  ;;  %v1222_v29 = vrot.slane %v1208_v41, 3  ;;  %v1270_v35 = vrot.slane %v1256_v26, 3 }
 0x21a   :  { %v1176_v21 = vsel %vm410_vm2, %v1174_v44, %v1175_v15  ;;  %v1224_v59 = vsel %vm410_vm2, %v1222_v29, %v1223_v48  ;;  %v1271_v42 = vsel %vm410_vm2, %v1265_v56, %v1270_v35 }
 0x21c   :  { %1025 = vrot.lane.b32.xlu0 %v1017_v28, %s1564_s3  ;;  %1072 = vrot.lane.b32.xlu1 %v1065_v19, %s1566_s18  ;;  %v1180_v28 = vrot.slane %v1166_v45, 3  ;;  %v1227_v19 = vrot.slane %v1212_v49, 3  ;;  %v1529_v45 = vld [vmem:[%s2515_s5 + $0x5] ss:$0 sm:$0xff] }
 0x21d   :  { %v684_v49 = vmul.f32 %v2214_v60, %v1529_v45  ;;  %v685_v38 = vmul.f32 %v1529_v45, %v2115_v43 }
 0x21e   :  { %v1181_v55 = vsel %vm410_vm2, %v1175_v15, %v1180_v28  ;;  %v1228_v2 = vsel %vm410_vm2, %v1223_v48, %v1227_v19  ;;  %v1326_v15 = vmul.f32 %v1320_v7, %v2386_v39  ;;  %v683_v48 = vmul.f32 %v1529_v45, %v2096_v16 }
 0x21f   :  { %v690_v28 = vrot.slane %v684_v49, 1 }
 0x220   :  { %1029 = vrot.lane.b32.xlu0 %v1022_v57, %s1564_s3  ;;  %1076 = vrot.lane.b32.xlu1 %v1069_v3, %s1566_s18  ;;  %v1219_v57 = vrot.slane %v1207_v52, 3  ;;  %v1267_v3 = vrot.slane %v1253_v46, 3  ;;  %v1340_v29 = vrot.slane %v1326_v15, 4  ;;  %v1410_v52 = vpop.permute.xlu1 %1409 }
 0x222   :  { %v1221_v8 = vsel %vm410_vm2, %v1219_v57, %v1220_v58  ;;  %v1269_v18 = vsel %vm410_vm2, %v1267_v3, %v1268_v4  ;;  %v1415_v3 = vmul.f32 %v2228_v1, %v1410_v52 }
 0x224   :  { %1070 = vrot.lane.b32.xlu0 %v1062_v9, %s1566_s18  ;;  %1141 = vrot.lane.b32.xlu1 %v1134_v10, %s1562_s21  ;;  %v1225_v9 = vrot.slane %v1211_v0, 3  ;;  %v1323_v10 = vmul.f32 %v1320_v7, %v2351_v24  ;;  %v692_v0 = vrot.slane %v685_v38, 1 }
 0x226   :  { %v1226_v25 = vsel %vm410_vm2, %v1220_v58, %v1225_v9  ;;  %v1412_v9 = vmul.f32 %v1410_v52, %v2374_v31 }
 0x228   :  { %1074 = vrot.lane.b32.xlu0 %v1067_v40, %s1566_s18  ;;  %1145 = vrot.lane.b32.xlu1 %v1138_v27, %s1562_s21  ;;  %v1264_v40 = vrot.slane %v1252_v20, 3  ;;  %v1337_v27 = vrot.slane %v1323_v10, 4  ;;  %v1414_v20 = vmul.f32 %v2214_v60, %v1410_v52 }
 0x22a   :  { %v1266_v33 = vsel %vm410_vm2, %v1264_v40, %v1265_v56  ;;  %v1339_v36 = vsel %vm1301_vm7, %v1337_v27, %v1338_v30 }
 0x22c   :  { %1139 = vrot.lane.b32.xlu0 %v1131_v34, %s1562_s21  ;;  %1186 = vrot.lane.b32.xlu1 %v1179_v37, %s1563_s30  ;;  %v1322_v34 = vmul.f32 %v1320_v7, %v2374_v31  ;;  %v1342_v37 = vrot.slane %v1327_v32, 4  ;;  %v1428_v32 = vrot.slane %v1415_v3, 4  ;;  %v1534_v3 = vld [vmem:[%s2515_s5 + $0xa] ss:$0 sm:$0xff] }
 0x22e   :  { %v1334_v41 = vrot.slane %v1322_v34, 4  ;;  %v1343_v44 = vsel %vm1301_vm7, %v1338_v30, %v1342_v37  ;;  %v1425_v34 = vrot.slane %v1414_v20, 4  ;;  %v1417_v37 = vmul.f32 %v1410_v52, %v2364_v22 }
 0x230   :  { %1143 = vrot.lane.b32.xlu0 %v1136_v54, %s1562_s21  ;;  %1190 = vrot.lane.b32.xlu1 %v1183_v47, %s1563_s30  ;;  %v1335_v54 = vrot.slane %v1324_v53, 4 }
 0x232   :  { %v1336_v47 = vsel %vm1301_vm7, %v1334_v41, %v1335_v54  ;;  %v1341_v50 = vsel %vm1301_vm7, %v1335_v54, %v1340_v29 }
 0x234   :  { %1184 = vrot.lane.b32.xlu0 %v1176_v21, %s1563_s30  ;;  %1231 = vrot.lane.b32.xlu1 %v1224_v59, %s1564_s3  ;;  %v689_v21 = vrot.slane %v683_v48, 1 }
 0x236   :  { %v691_v62 = vsel %vm129_vm1, %v689_v21, %v690_v28  ;;  %v1432_v21 = vrot.slane %v1417_v37, 4 }
 0x237   :  { %v696_v19 = vadd.f32 %v691_v62, %v2081_v17 }
 0x238   :  { %1188 = vrot.lane.b32.xlu0 %v1181_v55, %s1563_s30  ;;  %1235 = vrot.lane.b32.xlu1 %v1228_v2, %s1564_s3  ;;  %v1413_v2 = vmul.f32 %v1410_v52, %v2351_v24 }
 0x23a   :  { %v1427_v30 = vrot.slane %v1413_v2, 4 }
 0x23c   :  { %1229 = vrot.lane.b32.xlu0 %v1221_v8, %s1564_s3  ;;  %1276 = vrot.lane.b32.xlu1 %v1269_v18, %s1566_s18  ;;  %v1429_v45 = vsel %vm1301_vm7, %v1427_v30, %v1428_v32 }
 0x240   :  { %1233 = vrot.lane.b32.xlu0 %v1226_v25, %s1564_s3  ;;  %1280 = vrot.lane.b32.xlu1 %v1273_v14, %s1566_s18  ;;  %v693_v25 = vsel %vm129_vm1, %v690_v28, %v692_v0 }
 0x241   :  { %v697_v35 = vadd.f32 %v693_v25, %v2153_v12  ;;  %v889_v25 = vmul.f32 %v1534_v3, %v2222_v63 }
 0x244   :  { %1274 = vrot.lane.b32.xlu0 %v1266_v33, %s1566_s18  ;;  %1346 = vrot.lane.b32.xlu1 %v1339_v36, %s1562_s21  ;;  %v1424_v33 = vrot.slane %v1412_v9, 4 }
 0x246   :  { %v1426_v12 = vsel %vm1301_vm7, %v1424_v33, %v1425_v34 }
 0x248   :  { %1278 = vrot.lane.b32.xlu0 %v1271_v42, %s1566_s18  ;;  %1350 = vrot.lane.b32.xlu1 %v1343_v44, %s1562_s21  ;;  %v1416_v44 = vmul.f32 %v1410_v52, %v2386_v39 }
 0x24a   :  { %v1430_v62 = vrot.slane %v1416_v44, 4 }
 0x24c   :  { %1344 = vrot.lane.b32.xlu0 %v1336_v47, %s1562_s21  ;;  %v1431_v0 = vsel %vm1301_vm7, %v1425_v34, %v1430_v62  ;;  %v896_v34 = vrot.slane %v889_v25, 2 }
 0x250   :  { %1348 = vrot.lane.b32.xlu0 %v1341_v50, %s1562_s21 }
 0x256   :  { %v734_v59 = vpop.permute.xlu1 %733  ;;  %v732_v46 = vpop.permute.xlu0 %731 }
 0x257   :  { %v739_v16 = vsel %vm148_vm4, %v732_v46, %v734_v59 }
 0x258   :  { %v743_v55 = vadd.f32 %v739_v16, %v696_v19  ;;  %v1433_v16 = vsel %vm1301_vm7, %v1428_v32, %v1432_v21 }
 0x25a   :  { %v738_v57 = vpop.permute.xlu1 %737  ;;  %v1365_v58 = vpop.permute.xlu0 %1364 }
 0x25b   :  { %v1368_v4 = vmul.f32 %v1365_v58, %v2351_v24  ;;  %v1370_v5 = vmul.f32 %v2228_v1, %v1365_v58  ;;  %v1367_v7 = vmul.f32 %v1365_v58, %v2374_v31  ;;  %v1369_v17 = vmul.f32 %v2214_v60, %v1365_v58 }
 0x25c   :  { %v1372_v43 = vmul.f32 %v1365_v58, %v2364_v22  ;;  %v1371_v8 = vmul.f32 %v1365_v58, %v2386_v39 }
 0x25d   :  { %v1382_v23 = vrot.slane %v1368_v4, 4  ;;  %v1383_v18 = vrot.slane %v1370_v5, 4  ;;  %v1379_v61 = vrot.slane %v1367_v7, 4  ;;  %v1380_v10 = vrot.slane %v1369_v17, 4 }
 0x25e   :  { %v1455_v11 = vpop.permute.xlu0 %1454  ;;  %v779_v40 = vpop.permute.xlu1 %778  ;;  %v1387_v14 = vrot.slane %v1372_v43, 4  ;;  %v1385_v27 = vrot.slane %v1371_v8, 4  ;;  %v887_v8 = vmul.f32 %v1534_v3, %v2202_v51 }
 0x25f   :  { %v1384_v56 = vsel %vm1301_vm7, %v1382_v23, %v1383_v18  ;;  %v1381_v26 = vsel %vm1301_vm7, %v1379_v61, %v1380_v10  ;;  %v1458_v47 = vmul.f32 %v1455_v11, %v2351_v24  ;;  %v1460_v29 = vmul.f32 %v2228_v1, %v1455_v11 }
 0x260   :  { %1391 = vrot.lane.b32.xlu1 %v1384_v56, %s1563_s30  ;;  %1389 = vrot.lane.b32.xlu0 %v1381_v26, %s1563_s30  ;;  %v1388_v42 = vsel %vm1301_vm7, %v1383_v18, %v1387_v14  ;;  %v1386_v54 = vsel %vm1301_vm7, %v1380_v10, %v1385_v27  ;;  %v1457_v48 = vmul.f32 %v1455_v11, %v2374_v31 }
 0x261   :  { %v1459_v49 = vmul.f32 %v2214_v60, %v1455_v11  ;;  %v1472_v19 = vrot.slane %v1458_v47, 4  ;;  %v1473_v46 = vrot.slane %v1460_v29, 4  ;;  %v1462_v2 = vmul.f32 %v1455_v11, %v2364_v22 }
 0x262   :  { %v736_v36 = vpop.permute.xlu0 %735  ;;  %v783_v53 = vpop.permute.xlu1 %782  ;;  %v1469_v24 = vrot.slane %v1457_v48, 4  ;;  %v888_v23 = vmul.f32 %v2214_v60, %v1534_v3 }
 0x263   :  { %v740_v41 = vsel %vm148_vm4, %v736_v36, %v738_v57  ;;  %v1470_v38 = vrot.slane %v1459_v49, 4  ;;  %v1474_v5 = vsel %vm1301_vm7, %v1472_v19, %v1473_v46  ;;  %v1477_v9 = vrot.slane %v1462_v2, 4 }
 0x264   :  { %v744_v15 = vadd.f32 %v740_v41, %v697_v35  ;;  %1395 = vrot.lane.b32.xlu1 %v1388_v42, %s1563_s30  ;;  %1393 = vrot.lane.b32.xlu0 %v1386_v54, %s1563_s30  ;;  %v894_v26 = vrot.slane %v888_v23, 2 }
 0x265   :  { %v1471_v7 = vsel %vm1301_vm7, %v1469_v24, %v1470_v38  ;;  %v1478_v51 = vsel %vm1301_vm7, %v1473_v46, %v1477_v9 }
 0x266   :  { %v777_v50 = vpop.permute.xlu0 %776  ;;  %v824_v28 = vpop.permute.xlu1 %823  ;;  %v897_v41 = vsel %vm63_vm0, %v894_v26, %v896_v34 }
 0x267   :  { %v784_v52 = vsel %vm82_vm3, %v777_v50, %v779_v40  ;;  %v1539_v50 = vld [vmem:[%s2515_s5 + $0xf] ss:$0 sm:$0xff] }
 0x268   :  { %v788_v59 = vadd.f32 %v784_v52, %v743_v55  ;;  %1436 = vrot.lane.b32.xlu1 %v1429_v45, %s1564_s3  ;;  %1434 = vrot.lane.b32.xlu0 %v1426_v12, %s1564_s3  ;;  %v1461_v55 = vmul.f32 %v1455_v11, %v2386_v39  ;;  %v893_v11 = vrot.slane %v887_v8, 2  ;;  %v1091_v52 = vmul.f32 %v1539_v50, %v2298_v6 }
 0x26a   :  { %v781_v1 = vpop.permute.xlu0 %780  ;;  %v828_v57 = vpop.permute.xlu1 %827  ;;  %v1475_v20 = vrot.slane %v1461_v55, 4  ;;  %v895_v33 = vsel %vm63_vm0, %v893_v11, %v894_v26 }
 0x26b   :  { %v785_v58 = vsel %vm82_vm3, %v781_v1, %v783_v53  ;;  %v1097_v1 = vrot.slane %v1091_v52, 3 }
 0x26c   :  { %v789_v4 = vadd.f32 %v785_v58, %v744_v15  ;;  %1440 = vrot.lane.b32.xlu1 %v1433_v16, %s1564_s3  ;;  %1438 = vrot.lane.b32.xlu0 %v1431_v0, %s1564_s3  ;;  %v1476_v56 = vsel %vm1301_vm7, %v1470_v38, %v1475_v20  ;;  %v1093_v0 = vmul.f32 %v1539_v50, %v2310_v13 }
 0x26e   :  { %v822_v17 = vpop.permute.xlu0 %821  ;;  %v869_v43 = vpop.permute.xlu1 %868 }
 0x26f   :  { %v829_v22 = vsel %vm239_vm5, %v822_v17, %v824_v28 }
 0x270   :  { %v833_v18 = vadd.f32 %v829_v22, %v788_v59  ;;  %1481 = vrot.lane.b32.xlu1 %v1474_v5, %s1566_s18  ;;  %1479 = vrot.lane.b32.xlu0 %v1471_v7, %s1566_s18  ;;  %v1092_v59 = vmul.f32 %v2214_v60, %v1539_v50 }
 0x272   :  { %v826_v61 = vpop.permute.xlu0 %825  ;;  %v873_v10 = vpop.permute.xlu1 %872  ;;  %v1098_v58 = vrot.slane %v1092_v59, 3 }
 0x273   :  { %v830_v40 = vsel %vm239_vm5, %v826_v61, %v828_v57 }
 0x274   :  { %v834_v14 = vadd.f32 %v830_v40, %v789_v4  ;;  %1485 = vrot.lane.b32.xlu1 %v1478_v51, %s1566_s18  ;;  %1483 = vrot.lane.b32.xlu0 %v1476_v56, %s1566_s18  ;;  %v1099_v17 = vsel %vm410_vm2, %v1097_v1, %v1098_v58 }
 0x276   :  { %v867_v27 = vpop.permute.xlu0 %866  ;;  %v938_v30 = vpop.permute.xlu1 %937 }
 0x277   :  { %v874_v32 = vsel %vm669_vm6, %v867_v27, %v869_v43  ;;  %v1100_v43 = vrot.slane %v1093_v0, 3 }
 0x278   :  { %v878_v63 = vadd.f32 %v874_v32, %v833_v18 }
 0x279   :  { %v1101_v61 = vsel %vm410_vm2, %v1098_v58, %v1100_v43 }
 0x27a   :  { %v871_v35 = vpop.permute.xlu0 %870  ;;  %v900_v36 = vadd.f32 %v895_v33, %v878_v63  ;;  %v942_v53 = vpop.permute.xlu1 %941 }
 0x27b   :  { %v875_v37 = vsel %vm669_vm6, %v871_v35, %v873_v10 }
 0x27c   :  { %v879_v42 = vadd.f32 %v875_v37, %v834_v14 }
 0x27e   :  { %v936_v54 = vpop.permute.xlu0 %935  ;;  %v901_v44 = vadd.f32 %v897_v41, %v879_v42  ;;  %v983_v15 = vpop.permute.xlu1 %982  ;;  %v1544_v42 = vld [vmem:[%s2515_s5 + $0x14] ss:$0 sm:$0xff] }
 0x27f   :  { %v943_v62 = vsel %vm148_vm4, %v936_v54, %v938_v30 }
 0x280   :  { %v947_v46 = vadd.f32 %v943_v62, %v900_v36 }
 0x282   :  { %v940_v45 = vpop.permute.xlu0 %939  ;;  %v987_v12 = vpop.permute.xlu1 %986 }
 0x283   :  { %v944_v16 = vsel %vm148_vm4, %v940_v45, %v942_v53  ;;  %v1295_v45 = vmul.f32 %v1544_v42, %v2374_v31  ;;  %v1297_v31 = vmul.f32 %v1544_v42, %v2386_v39 }
 0x284   :  { %v948_v55 = vadd.f32 %v944_v16, %v901_v44 }
 0x285   :  { %v1302_v52 = vrot.slane %v1295_v45, 4 }
 0x286   :  { %v981_v47 = vpop.permute.xlu0 %980  ;;  %v1028_v29 = vpop.permute.xlu1 %1027 }
 0x287   :  { %v988_v19 = vsel %vm82_vm3, %v981_v47, %v983_v15  ;;  %v1296_v47 = vmul.f32 %v2214_v60, %v1544_v42 }
 0x288   :  { %v992_v2 = vadd.f32 %v988_v19, %v947_v46 }
 0x289   :  { %v1303_v19 = vrot.slane %v1296_v47, 4 }
 0x28a   :  { %v985_v48 = vpop.permute.xlu0 %984  ;;  %v1032_v49 = vpop.permute.xlu1 %1031 }
 0x28b   :  { %v989_v6 = vsel %vm82_vm3, %v985_v48, %v987_v12  ;;  %v1304_v0 = vsel %vm1301_vm7, %v1302_v52, %v1303_v19 }
 0x28c   :  { %v993_v8 = vadd.f32 %v989_v6, %v948_v55 }
 0x28e   :  { %v1026_v21 = vpop.permute.xlu0 %1025  ;;  %v1073_v28 = vpop.permute.xlu1 %1072 }
 0x28f   :  { %v1033_v57 = vsel %vm239_vm5, %v1026_v21, %v1028_v29 }
 0x290   :  { %v1037_v3 = vadd.f32 %v1033_v57, %v992_v2  ;;  %v1305_v2 = vrot.slane %v1297_v31, 4 }
 0x292   :  { %v1030_v24 = vpop.permute.xlu0 %1029  ;;  %v1077_v38 = vpop.permute.xlu1 %1076 }
 0x293   :  { %v1034_v5 = vsel %vm239_vm5, %v1030_v24, %v1032_v49 }
 0x294   :  { %v1038_v20 = vadd.f32 %v1034_v5, %v993_v8 }
 0x296   :  { %v1071_v4 = vpop.permute.xlu0 %1070  ;;  %v1142_v9 = vpop.permute.xlu1 %1141 }
 0x297   :  { %v1078_v7 = vsel %vm669_vm6, %v1071_v4, %v1073_v28 }
 0x298   :  { %v1082_v22 = vadd.f32 %v1078_v7, %v1037_v3  ;;  %v1306_v7 = vsel %vm1301_vm7, %v1303_v19, %v1305_v2 }
 0x29a   :  { %v1075_v23 = vpop.permute.xlu0 %1074  ;;  %v1104_v18 = vadd.f32 %v1099_v17, %v1082_v22  ;;  %v1146_v25 = vpop.permute.xlu1 %1145 }
 0x29b   :  { %v1079_v13 = vsel %vm669_vm6, %v1075_v23, %v1077_v38 }
 0x29c   :  { %v1083_v10 = vadd.f32 %v1079_v13, %v1038_v20 }
 0x29e   :  { %v1140_v11 = vpop.permute.xlu0 %1139  ;;  %v1105_v40 = vadd.f32 %v1101_v61, %v1083_v10  ;;  %v1187_v56 = vpop.permute.xlu1 %1186 }
 0x29f   :  { %v1147_v15 = vsel %vm148_vm4, %v1140_v11, %v1142_v9 }
 0x2a0   :  { %v1151_v29 = vadd.f32 %v1147_v15, %v1104_v18 }
 0x2a2   :  { %v1144_v51 = vpop.permute.xlu0 %1143  ;;  %v1191_v14 = vpop.permute.xlu1 %1190 }
 0x2a3   :  { %v1148_v50 = vsel %vm148_vm4, %v1144_v51, %v1146_v25 }
 0x2a4   :  { %v1152_v46 = vadd.f32 %v1148_v50, %v1105_v40 }
 0x2a6   :  { %v1185_v26 = vpop.permute.xlu0 %1184  ;;  %v1232_v30 = vpop.permute.xlu1 %1231 }
 0x2a7   :  { %v1192_v12 = vsel %vm82_vm3, %v1185_v26, %v1187_v56 }
 0x2a8   :  { %v1196_v28 = vadd.f32 %v1192_v12, %v1151_v29 }
 0x2aa   :  { %v1189_v27 = vpop.permute.xlu0 %1188  ;;  %v1236_v33 = vpop.permute.xlu1 %1235 }
 0x2ab   :  { %v1193_v62 = vsel %vm82_vm3, %v1189_v27, %v1191_v14 }
 0x2ac   :  { %v1197_v16 = vadd.f32 %v1193_v62, %v1152_v46 }
 0x2ae   :  { %v1230_v32 = vpop.permute.xlu0 %1229  ;;  %v1277_v63 = vpop.permute.xlu1 %1276 }
 0x2af   :  { %v1237_v21 = vsel %vm239_vm5, %v1230_v32, %v1232_v30 }
 0x2b0   :  { %v1241_v24 = vadd.f32 %v1237_v21, %v1196_v28 }
 0x2b2   :  { %v1234_v34 = vpop.permute.xlu0 %1233  ;;  %v1281_v36 = vpop.permute.xlu1 %1280 }
 0x2b3   :  { %v1238_v1 = vsel %vm239_vm5, %v1234_v34, %v1236_v33 }
 0x2b4   :  { %v1242_v6 = vadd.f32 %v1238_v1, %v1197_v16 }
 0x2b6   :  { %v1275_v35 = vpop.permute.xlu0 %1274  ;;  %v1347_v37 = vpop.permute.xlu1 %1346 }
 0x2b7   :  { %v1282_v59 = vsel %vm669_vm6, %v1275_v35, %v1277_v63 }
 0x2b8   :  { %v1286_v57 = vadd.f32 %v1282_v59, %v1241_v24 }
 0x2ba   :  { %v1279_v53 = vpop.permute.xlu0 %1278  ;;  %v1351_v54 = vpop.permute.xlu1 %1350  ;;  %v1309_v39 = vadd.f32 %v1304_v0, %v1286_v57 }
 0x2bb   :  { %v1283_v58 = vsel %vm669_vm6, %v1279_v53, %v1281_v36 }
 0x2bc   :  { %v1287_v5 = vadd.f32 %v1283_v58, %v1242_v6 }
 0x2be   :  { %v1345_v41 = vpop.permute.xlu0 %1344  ;;  %v1310_v23 = vadd.f32 %v1306_v7, %v1287_v5 }
 0x2bf   :  { %v1352_v4 = vsel %vm148_vm4, %v1345_v41, %v1347_v37 }
 0x2c0   :  { %v1356_v43 = vadd.f32 %v1352_v4, %v1309_v39 }
 0x2c2   :  { %v1349_v44 = vpop.permute.xlu0 %1348 }
 0x2c3   :  { %v1353_v9 = vsel %vm148_vm4, %v1349_v44, %v1351_v54 }
 0x2c4   :  { %v1357_v61 = vadd.f32 %v1353_v9, %v1310_v23 }
 0x2d2   :  { %v1392_v48 = vpop.permute.xlu1 %1391  ;;  %v1390_v49 = vpop.permute.xlu0 %1389 }
 0x2d3   :  { %v1397_v17 = vsel %vm82_vm3, %v1390_v49, %v1392_v48 }
 0x2d4   :  { %v1401_v18 = vadd.f32 %v1397_v17, %v1356_v43 }
 0x2d6   :  { %v1396_v38 = vpop.permute.xlu1 %1395  ;;  %v1394_v60 = vpop.permute.xlu0 %1393 }
 0x2d7   :  { %v1398_v13 = vsel %vm82_vm3, %v1394_v60, %v1396_v38 }
 0x2d8   :  { %v1402_v56 = vadd.f32 %v1398_v13, %v1357_v61 }
 0x2da   :  { %v1437_v55 = vpop.permute.xlu1 %1436  ;;  %v1435_v3 = vpop.permute.xlu0 %1434 }
 0x2db   :  { %v1442_v20 = vsel %vm239_vm5, %v1435_v3, %v1437_v55 }
 0x2dc   :  { %v1446_v10 = vadd.f32 %v1442_v20, %v1401_v18 }
 0x2de   :  { %v1441_v8 = vpop.permute.xlu1 %1440  ;;  %v1439_v22 = vpop.permute.xlu0 %1438 }
 0x2df   :  { %v1443_v40 = vsel %vm239_vm5, %v1439_v22, %v1441_v8 }
 0x2e0   :  { %v1447_v14 = vadd.f32 %v1443_v40, %v1402_v56 }
 0x2e2   :  { %v1482_v11 = vpop.permute.xlu1 %1481  ;;  %v1480_v25 = vpop.permute.xlu0 %1479 }
 0x2e3   :  { %v1487_v51 = vsel %vm669_vm6, %v1480_v25, %v1482_v11 }
 0x2e4   :  { %v1491_v26 = vadd.f32 %v1487_v51, %v1446_v10 }
 0x2e6   :  { %v1493_v27 = vmax.f32 %v1491_v26, 0.0  ;;  %v1486_v30 = vpop.permute.xlu1 %1485  ;;  %v1484_v32 = vpop.permute.xlu0 %1483 }
 0x2e7   :  { %v1488_v33 = vsel %vm669_vm6, %v1484_v32, %v1486_v30 }
 0x2e8   :  { %v1495_v34 = vmin.f32 %v1493_v27, 6.0  ;;  %v1492_v63 = vadd.f32 %v1488_v33, %v1447_v14 }
 0x2ea   :  { %1497 = vst [vmem:[%s2522_s9] sm:$0xff] %v1495_v34  ;;  %v1494_v35 = vmax.f32 %v1492_v63, 0.0 }
 0x2ec   :  { %v1496_v36 = vmin.f32 %v1494_v35, 6.0 }
 0x2ee   :  { %1498 = vst [vmem:[%s2522_s9 + $0x8] sm:$0xff] %v1496_v36 }

</bundles_post_ra>
